<compile_context>
chip_gen: v7x
topology: tpu7x:2x2x1
jax: 0.10.0
libtpu: 0.0.40
codegen_flags: <defaults>
</compile_context>

<pallas_src>
import jax
import jax.numpy as jnp
from jax.experimental import pallas as pl
from jax.experimental.pallas import tpu as pltpu


def _pick_row_strip(H):
    """Largest divisor of H that is <= 16 (strip of output rows per iteration)."""
    for r in range(min(16, H), 0, -1):
        if H % r == 0:
            return r
    return 1


def dwconv3x3_kernel(x_ref, w_ref, b_ref, o_ref):
    # x_ref: (1, H, W, Cb) unpadded activations for one (batch, channel-block)
    # w_ref: (3, 3, Cb) per-channel taps (ky, kx, c);  b_ref: (1, Cb) bias
    # o_ref: (1, H, W, Cb)
    H, W, C = o_ref.shape[1], o_ref.shape[2], o_ref.shape[3]
    R = _pick_row_strip(H)
    num_strips = H // R

    # Loop-invariant values, hoisted (JAX does not CSE broadcast_in_dim).
    wf = w_ref[...].astype(jnp.float32)                                  # (3, 3, C)
    bias_full = jnp.broadcast_to(
        b_ref[...].astype(jnp.float32).reshape(1, 1, C), (R, W, C))
    col = jax.lax.broadcasted_iota(jnp.int32, (R, W, C), 1)
    not_first_col = col > 0            # kills wrap of roll(+1)
    not_last_col = col < W - 1         # kills wrap of roll(-1)
    zrow = jnp.zeros((1, W, C), jnp.float32)

    def compute_strip(slab, r0_store):
        # slab: (R+2, W, C) f32, rows r0-1 .. r0+R (zero rows at image edges).
        top = slab[0:R]            # input row h-1 for output row h  (ky = 0 taps)
        mid = slab[1:R + 1]        # input row h                     (ky = 1 taps)
        bot = slab[2:R + 2]        # input row h+1                   (ky = 2 taps)

        # Vertical tap sums per kernel column; the W-shift is factored out of the
        # weighted sums (exact: weights are constant along W), so only 2 rolls.
        vert_l = top * wf[0, 0] + mid * wf[1, 0] + bot * wf[2, 0]
        vert_c = top * wf[0, 1] + mid * wf[1, 1] + bot * wf[2, 1]
        vert_r = top * wf[0, 2] + mid * wf[1, 2] + bot * wf[2, 2]

        acc = bias_full + vert_c
        acc = acc + jnp.where(not_first_col,
                              pltpu.roll(vert_l, shift=1, axis=1), 0.0)
        acc = acc + jnp.where(not_last_col,
                              pltpu.roll(vert_r, shift=W - 1, axis=1), 0.0)
        # Exactly one lane-dense store per strip, single cast at the store.
        o_ref[0, pl.ds(r0_store, R)] = acc.astype(o_ref.dtype)

    if num_strips == 1:
        # Single strip covers the whole image; zero-pad both halo rows.
        slab = jnp.concatenate(
            [zrow, x_ref[0, pl.ds(0, H)].astype(jnp.float32), zrow], axis=0)
        compute_strip(slab, 0)
    else:
        # Peeled first strip: zero top halo row.
        slab0 = jnp.concatenate(
            [zrow, x_ref[0, pl.ds(0, R + 1)].astype(jnp.float32)], axis=0)
        compute_strip(slab0, 0)

        # Steady-state interior strips: no clamps, no edge handling.
        n_int = num_strips - 2
        if n_int > 0:
            def body(s, carry):
                r0 = s * R
                slab = x_ref[0, pl.ds(r0 - 1, R + 2)].astype(jnp.float32)
                compute_strip(slab, r0)
                return carry
            jax.lax.fori_loop(1, num_strips - 1, body, 0,
                              unroll=(n_int if n_int <= 4 else 4))

        # Peeled last strip: zero bottom halo row.
        r0_last = H - R
        slab1 = jnp.concatenate(
            [x_ref[0, pl.ds(r0_last - 1, R + 1)].astype(jnp.float32), zrow],
            axis=0)
        compute_strip(slab1, r0_last)


def _footprint_bytes(H, W, cb, R, itemsize):
    """Per-grid-step VMEM footprint estimate."""
    io = 4 * H * W * cb * itemsize           # double-buffered input + output blocks
    tmp = 10 * (R + 2) * W * cb * 4          # f32 slab, vert sums, acc, roll temps
    wts = 4 * (9 * cb + cb) * 2              # weights + bias (double-buffered)
    return io + tmp + wts


def _pick_channel_block(C, H, W, R, itemsize, vmem_cap):
    """Largest multiple-of-128 divisor of C whose footprint fits the VMEM budget."""
    if C % 128 != 0:
        # TODO(synk): sub-128 channel counts fall back to one (lane-masked) block.
        return C
    budget = int(0.6 * vmem_cap)
    best = 128
    for cb in range(128, C + 1, 128):
        if C % cb == 0 and _footprint_bytes(H, W, cb, R, itemsize) <= budget:
            best = cb
    return best


def dwconv_forward(x, weight, bias, H, W):
    """DWConv forward.

    x     : (B, N, C) with N == H*W
    weight: (3, 3, C)   (torch weight (C, 1, 3, 3) stored taps-first, channel-last)
    bias  : (C,)
    returns (B, N, C)
    """
    B, N, C = x.shape
    assert N == H * W, "sequence length must equal H*W"

    x_img = x.reshape(B, H, W, C)            # free reshape; no transpose, no pad
    b2 = bias.reshape(1, C)

    R = _pick_row_strip(H)
    try:
        vmem_cap = int(pltpu.get_tpu_info().vmem_capacity_bytes)
    except Exception:
        vmem_cap = 64 * 2**20                # conservative (v7x-sized) fallback

    cb = _pick_channel_block(C, H, W, R, x.dtype.itemsize, vmem_cap)
    num_cb = C // cb
    # Give v7x's two TensorCores (and the pipeline) at least a few grid steps.
    while B * num_cb < 4 and cb % 256 == 0:
        cb //= 2
        num_cb = C // cb

    fp = _footprint_bytes(H, W, cb, R, x.dtype.itemsize)
    vmem_limit = int(min(0.75 * vmem_cap, max(32 * 2**20, 2 * fp)))

    out = pl.pallas_call(
        dwconv3x3_kernel,
        out_shape=jax.ShapeDtypeStruct((B, H, W, C), x.dtype),
        grid_spec=pltpu.PrefetchScalarGridSpec(
            num_scalar_prefetch=0,
            grid=(B, num_cb),                # batch x channel-block, both parallel
            in_specs=[
                pl.BlockSpec((1, H, W, cb), lambda b, c: (b, 0, 0, c)),
                pl.BlockSpec((3, 3, cb), lambda b, c: (0, 0, c)),
                pl.BlockSpec((1, cb), lambda b, c: (0, c)),
            ],
            out_specs=pl.BlockSpec((1, H, W, cb), lambda b, c: (b, 0, 0, c)),
        ),
        compiler_params=pltpu.CompilerParams(
            dimension_semantics=("parallel", "parallel"),
            vmem_limit_bytes=vmem_limit,
        ),
    )(x_img, weight, b2)

    return out.reshape(B, H * W, C)


if __name__ == "__main__":
    key = jax.random.PRNGKey(0)
    B, H, W, C = 2, 16, 16, 128              # small, lane-friendly (C on lane axis)
    N = H * W

    k1, k2, k3 = jax.random.split(key, 3)
    x = jax.random.normal(k1, (B, N, C), dtype=jnp.float32)
    # torch Conv2d(C, C, 3, groups=C) has weight (C, 1, 3, 3) and bias (C,);
    # we store the weight as (3, 3, C) (taps-first, channel-last).
    weight = 0.1 * jax.random.normal(k2, (3, 3, C), dtype=jnp.float32)
    bias = 0.1 * jax.random.normal(k3, (C,), dtype=jnp.float32)

    out = dwconv_forward(x, weight, bias, H, W)
    out = jax.block_until_ready(out)

    # Pure-JAX reference (same math as the torch depthwise conv).
    x_img = x.reshape(B, H, W, C)
    w_hwio = weight.reshape(3, 3, 1, C)
    ref = jax.lax.conv_general_dilated(
        x_img, w_hwio, window_strides=(1, 1), padding="SAME",
        dimension_numbers=("NHWC", "HWIO", "NHWC"),
        feature_group_count=C) + bias
    ref = ref.reshape(B, N, C)

    assert out.shape == (B, N, C) and out.dtype == x.dtype
    assert jnp.allclose(out, ref, atol=1e-4, rtol=1e-4), "mismatch vs reference"

    print("KERNEL_OK")
</pallas_src>

<mosaic_0001>
module attributes {stable_mosaic.version = 11 : i64} {
  func.func @dwconv3x3_kernel(%arg0: i32, %arg1: i32, %arg2: memref<1x16x16x128xf32, #tpu.memory_space<vmem>>, %arg3: memref<3x3x128xf32, #tpu.memory_space<vmem>>, %arg4: memref<1x128xf32, #tpu.memory_space<vmem>>, %arg5: memref<1x16x16x128xf32, #tpu.memory_space<vmem>>) attributes {dimension_semantics = [#tpu.dimension_semantics<parallel>, #tpu.dimension_semantics<parallel>], iteration_bounds = array<i64: 2, 1>, scalar_prefetch = 0 : i64, scratch_operands = 0 : i64, tpu.core_type = #tpu.core_type<tc>, window_params = [{transform_indices = @transform_0, window_bounds = array<i64: 1, 16, 16, 128>}, {transform_indices = @transform_1, window_bounds = array<i64: 3, 3, 128>}, {transform_indices = @transform_2, window_bounds = array<i64: 1, 128>}, {transform_indices = @transform_3, window_bounds = array<i64: 1, 16, 16, 128>}]} {
    %c0 = arith.constant 0 : index
    %c0_0 = arith.constant 0 : index
    %c0_1 = arith.constant 0 : index
    %0 = vector.load %arg3[%c0, %c0_0, %c0_1] : memref<3x3x128xf32, #tpu.memory_space<vmem>>, vector<3x3x128xf32>
    %c0_2 = arith.constant 0 : index
    %c0_3 = arith.constant 0 : index
    %1 = vector.load %arg4[%c0_2, %c0_3] : memref<1x128xf32, #tpu.memory_space<vmem>>, vector<1x128xf32>
    %2 = vector.shape_cast %1 : vector<1x128xf32> to vector<1x1x128xf32>
    %3 = vector.shape_cast %2 : vector<1x1x128xf32> to vector<1x1x128xf32>
    %4 = vector.broadcast %3 : vector<1x1x128xf32> to vector<16x16x128xf32>
    %5 = tpu.iota {dimensions = array<i32: 1>} : vector<16x16x128xi32>
    %c0_i32 = arith.constant 0 : i32
    %6 = vector.broadcast %c0_i32 : i32 to vector<16x16x128xi32>
    %7 = arith.cmpi sgt, %5, %6 : vector<16x16x128xi32>
    %c15_i32 = arith.constant 15 : i32
    %8 = vector.broadcast %c15_i32 : i32 to vector<16x16x128xi32>
    %9 = arith.cmpi slt, %5, %8 : vector<16x16x128xi32>
    %cst = arith.constant 0.000000e+00 : f32
    %10 = vector.broadcast %cst : f32 to vector<1x16x128xf32>
    %c0_4 = arith.constant 0 : index
    %c0_5 = arith.constant 0 : index
    %c0_6 = arith.constant 0 : index
    %c0_7 = arith.constant 0 : index
    %11 = vector.load %arg2[%c0_4, %c0_5, %c0_6, %c0_7] : memref<1x16x16x128xf32, #tpu.memory_space<vmem>>, vector<1x16x16x128xf32>
    %12 = vector.shape_cast %11 : vector<1x16x16x128xf32> to vector<16x16x128xf32>
    %13 = tpu.concatenate %10, %12, %10 in 0 : vector<1x16x128xf32>, vector<16x16x128xf32>, vector<1x16x128xf32> -> vector<18x16x128xf32>
    %14 = vector.extract_strided_slice %13 {offsets = [0, 0, 0], sizes = [16, 16, 128], strides = [1, 1, 1]} : vector<18x16x128xf32> to vector<16x16x128xf32>
    %15 = vector.extract_strided_slice %13 {offsets = [1, 0, 0], sizes = [16, 16, 128], strides = [1, 1, 1]} : vector<18x16x128xf32> to vector<16x16x128xf32>
    %16 = vector.extract_strided_slice %13 {offsets = [2, 0, 0], sizes = [16, 16, 128], strides = [1, 1, 1]} : vector<18x16x128xf32> to vector<16x16x128xf32>
    %17 = vector.extract_strided_slice %0 {offsets = [0, 0, 0], sizes = [1, 1, 128], strides = [1, 1, 1]} : vector<3x3x128xf32> to vector<1x1x128xf32>
    %18 = vector.shape_cast %17 : vector<1x1x128xf32> to vector<128xf32>
    %19 = vector.shape_cast %18 : vector<128xf32> to vector<1x1x128xf32>
    %20 = vector.broadcast %19 : vector<1x1x128xf32> to vector<16x16x128xf32>
    %21 = arith.mulf %14, %20 : vector<16x16x128xf32>
    %22 = vector.extract_strided_slice %0 {offsets = [1, 0, 0], sizes = [1, 1, 128], strides = [1, 1, 1]} : vector<3x3x128xf32> to vector<1x1x128xf32>
    %23 = vector.shape_cast %22 : vector<1x1x128xf32> to vector<128xf32>
    %24 = vector.shape_cast %23 : vector<128xf32> to vector<1x1x128xf32>
    %25 = vector.broadcast %24 : vector<1x1x128xf32> to vector<16x16x128xf32>
    %26 = arith.mulf %15, %25 : vector<16x16x128xf32>
    %27 = arith.addf %21, %26 : vector<16x16x128xf32>
    %28 = vector.extract_strided_slice %0 {offsets = [2, 0, 0], sizes = [1, 1, 128], strides = [1, 1, 1]} : vector<3x3x128xf32> to vector<1x1x128xf32>
    %29 = vector.shape_cast %28 : vector<1x1x128xf32> to vector<128xf32>
    %30 = vector.shape_cast %29 : vector<128xf32> to vector<1x1x128xf32>
    %31 = vector.broadcast %30 : vector<1x1x128xf32> to vector<16x16x128xf32>
    %32 = arith.mulf %16, %31 : vector<16x16x128xf32>
    %33 = arith.addf %27, %32 : vector<16x16x128xf32>
    %34 = vector.extract_strided_slice %0 {offsets = [0, 1, 0], sizes = [1, 1, 128], strides = [1, 1, 1]} : vector<3x3x128xf32> to vector<1x1x128xf32>
    %35 = vector.shape_cast %34 : vector<1x1x128xf32> to vector<128xf32>
    %36 = vector.shape_cast %35 : vector<128xf32> to vector<1x1x128xf32>
    %37 = vector.broadcast %36 : vector<1x1x128xf32> to vector<16x16x128xf32>
    %38 = arith.mulf %14, %37 : vector<16x16x128xf32>
    %39 = vector.extract_strided_slice %0 {offsets = [1, 1, 0], sizes = [1, 1, 128], strides = [1, 1, 1]} : vector<3x3x128xf32> to vector<1x1x128xf32>
    %40 = vector.shape_cast %39 : vector<1x1x128xf32> to vector<128xf32>
    %41 = vector.shape_cast %40 : vector<128xf32> to vector<1x1x128xf32>
    %42 = vector.broadcast %41 : vector<1x1x128xf32> to vector<16x16x128xf32>
    %43 = arith.mulf %15, %42 : vector<16x16x128xf32>
    %44 = arith.addf %38, %43 : vector<16x16x128xf32>
    %45 = vector.extract_strided_slice %0 {offsets = [2, 1, 0], sizes = [1, 1, 128], strides = [1, 1, 1]} : vector<3x3x128xf32> to vector<1x1x128xf32>
    %46 = vector.shape_cast %45 : vector<1x1x128xf32> to vector<128xf32>
    %47 = vector.shape_cast %46 : vector<128xf32> to vector<1x1x128xf32>
    %48 = vector.broadcast %47 : vector<1x1x128xf32> to vector<16x16x128xf32>
    %49 = arith.mulf %16, %48 : vector<16x16x128xf32>
    %50 = arith.addf %44, %49 : vector<16x16x128xf32>
    %51 = vector.extract_strided_slice %0 {offsets = [0, 2, 0], sizes = [1, 1, 128], strides = [1, 1, 1]} : vector<3x3x128xf32> to vector<1x1x128xf32>
    %52 = vector.shape_cast %51 : vector<1x1x128xf32> to vector<128xf32>
    %53 = vector.shape_cast %52 : vector<128xf32> to vector<1x1x128xf32>
    %54 = vector.broadcast %53 : vector<1x1x128xf32> to vector<16x16x128xf32>
    %55 = arith.mulf %14, %54 : vector<16x16x128xf32>
    %56 = vector.extract_strided_slice %0 {offsets = [1, 2, 0], sizes = [1, 1, 128], strides = [1, 1, 1]} : vector<3x3x128xf32> to vector<1x1x128xf32>
    %57 = vector.shape_cast %56 : vector<1x1x128xf32> to vector<128xf32>
    %58 = vector.shape_cast %57 : vector<128xf32> to vector<1x1x128xf32>
    %59 = vector.broadcast %58 : vector<1x1x128xf32> to vector<16x16x128xf32>
    %60 = arith.mulf %15, %59 : vector<16x16x128xf32>
    %61 = arith.addf %55, %60 : vector<16x16x128xf32>
    %62 = vector.extract_strided_slice %0 {offsets = [2, 2, 0], sizes = [1, 1, 128], strides = [1, 1, 1]} : vector<3x3x128xf32> to vector<1x1x128xf32>
    %63 = vector.shape_cast %62 : vector<1x1x128xf32> to vector<128xf32>
    %64 = vector.shape_cast %63 : vector<128xf32> to vector<1x1x128xf32>
    %65 = vector.broadcast %64 : vector<1x1x128xf32> to vector<16x16x128xf32>
    %66 = arith.mulf %16, %65 : vector<16x16x128xf32>
    %67 = arith.addf %61, %66 : vector<16x16x128xf32>
    %68 = arith.addf %4, %50 : vector<16x16x128xf32>
    %c1_i32 = arith.constant 1 : i32
    %69 = tpu.dynamic_rotate %33 by %c1_i32 dim 1 : vector<16x16x128xf32>, i32 -> vector<16x16x128xf32>
    %cst_8 = arith.constant 0.000000e+00 : f32
    %70 = vector.broadcast %cst_8 : f32 to vector<16x16x128xf32>
    %71 = arith.select %7, %69, %70 : vector<16x16x128xi1>, vector<16x16x128xf32>
    %72 = arith.addf %68, %71 : vector<16x16x128xf32>
    %c15_i32_9 = arith.constant 15 : i32
    %73 = tpu.dynamic_rotate %67 by %c15_i32_9 dim 1 : vector<16x16x128xf32>, i32 -> vector<16x16x128xf32>
    %cst_10 = arith.constant 0.000000e+00 : f32
    %74 = vector.broadcast %cst_10 : f32 to vector<16x16x128xf32>
    %75 = arith.select %9, %73, %74 : vector<16x16x128xi1>, vector<16x16x128xf32>
    %76 = arith.addf %72, %75 : vector<16x16x128xf32>
    %c0_11 = arith.constant 0 : index
    %c0_12 = arith.constant 0 : index
    %c0_13 = arith.constant 0 : index
    %c0_14 = arith.constant 0 : index
    %77 = vector.load %arg5[%c0_11, %c0_12, %c0_13, %c0_14] : memref<1x16x16x128xf32, #tpu.memory_space<vmem>>, vector<1x16x16x128xf32>
    %78 = vector.shape_cast %77 : vector<1x16x16x128xf32> to vector<16x16x128xf32>
    %79 = vector.shape_cast %76 : vector<16x16x128xf32> to vector<1x16x16x128xf32>
    tpu.vector_store %arg5[%c0_11, %c0_12, %c0_13, %c0_14], %79 {strides = array<i32>} : memref<1x16x16x128xf32, #tpu.memory_space<vmem>>, vector<1x16x16x128xf32>,
    return
  }
  func.func @transform_0(%arg0: i32, %arg1: i32) -> (i32, i32, i32, i32) {
    %c0_i32 = arith.constant 0 : i32
    %c0_i32_0 = arith.constant 0 : i32
    %c0_i32_1 = arith.constant 0 : i32
    return %arg0, %c0_i32, %c0_i32_0, %arg1 : i32, i32, i32, i32
  }
  func.func @transform_1(%arg0: i32, %arg1: i32) -> (i32, i32, i32) {
    %c0_i32 = arith.constant 0 : i32
    %c0_i32_0 = arith.constant 0 : i32
    %c0_i32_1 = arith.constant 0 : i32
    return %c0_i32, %c0_i32_0, %arg1 : i32, i32, i32
  }
  func.func @transform_2(%arg0: i32, %arg1: i32) -> (i32, i32) {
    %c0_i32 = arith.constant 0 : i32
    %c0_i32_0 = arith.constant 0 : i32
    return %c0_i32, %arg1 : i32, i32
  }
  func.func @transform_3(%arg0: i32, %arg1: i32) -> (i32, i32, i32, i32) {
    %c0_i32 = arith.constant 0 : i32
    %c0_i32_0 = arith.constant 0 : i32
    %c0_i32_1 = arith.constant 0 : i32
    return %arg0, %c0_i32, %c0_i32_0, %arg1 : i32, i32, i32, i32
  }
}

</mosaic_0001>

<bundles_post_ra>
// kernel: tpu_custom_call.1
= control target key start
LH: loop header
LB: loop body
LE: loop exit
PB: predicated region body
PF: predicated region fallthrough
CT: control target
= control target key end

     0   :  { %8 = vsyncpa [#allocation3], 0  ;;  %s2701_s0 = inlined_call_operand.hbm [shape: f32[2,16,16,128], index: 0, kind: input, shape index: {}]   ;;  %s2702_s1 = inlined_call_operand.hbm [shape: f32[3,3,128], index: 1, kind: input, shape index: {}]   ;;  %s2703_s2 = inlined_call_operand.vmem [shape: f32[1,128], index: 2, kind: input, shape index: {}]   ;;  %s2704_s3 = inlined_call_operand.hbm [shape: f32[2,16,16,128], index: 3, kind: output, shape index: {}]  }
   0x1   :  { %10 = vsyncpa [#allocation3 + $0x1], 0 }
   0x2   :  { %11 = vsyncpa [#allocation6], 0 }
   0x3   :  { %12 = vsyncpa [#allocation4], 0 }
   0x4   :  { %14 = vsyncpa [#allocation4 + $0x1], 0  ;;  %s1523_s12 = smov 0   ;;  %s1525_s13 = smov 0  }
   0x5   :  { %s1527_s14 = smov 0   ;;  %s1529_s15 = smov 0  }
   0x6   :  { %s1531_s16 = smov 0   ;;  %s1533_s17 = smov 0  }
   0x7 LB: > { %s1247_s18 = sadd.s32 4294967295, %s1492_s17   ;;  %s1248_s19 = sadd.s32 4294967294, %s1492_s17   ;;  %s1492_s17 = sphi %s1533_s17, %s20_s17   ;;  %s1488_s16 = sphi %s1531_s16, %s2728_s16   ;;  %s1484_s15 = sphi %s1529_s15, %s2727_s15   ;;  %s1480_s14 = sphi %s1527_s14, %s2726_s14   ;;  %s1476_s13 = sphi %s1525_s13, %s2725_s13   ;;  %s1472_s12 = sphi %s1523_s12, %s2724_s12  }
   0x8   : > { %p54_p0 = scmp.ne.s32.totalorder %s1476_s13, %s1472_s12  ;;  %p1557_p1 = scmp.eq.s32.totalorder %s1247_s18, 0 }
   0x9   : > { %p1561_p2 = scmp.eq.s32.totalorder %s1247_s18, 1  ;;  %p138_p3 = scmp.eq.s32.totalorder %s1248_s19, 1 }
   0xa   : > { %s2709_s20 = scalar_select %p1557_p1, 1, 0 }
   0xb   : > { %s2710_s21 = scalar_select %p1561_p2, 1, 0 }
   0xc   : > { %p1567_p4 = por %p1557_p1, %p54_p0  ;;  %p1249_p5 = scmp.ge.s32.totalorder %s1492_s17, 1 }
   0xd   : > { %p1572_p6 = por %p138_p3, %p54_p0  ;;  %p145_p7 = scmp.lt.s32.totalorder %s1492_s17, 3 }
   0xe   : > { %s2711_s22 = scalar_select %p1567_p4, 1, 0 }
   0xf   : > { %s2712_s23 = scalar_select %p1572_p6, 1, 0 }
  0x10   : > { %p1577_p8 = pnand %p1249_p5, %p145_p7  ;;  %s1494_s25 = smov [#allocation5]  }
  0x11   : > { %s159_s26 = sshll.u32 %s1494_s25, 4  ;;  %s32_s28 = sadd.s32 1, %s1488_s16  ;;  %s160_s26 = int_to_ptr.vmem [resolvable:$true] %s159_s26 }
  0x12   : > { %s2713_s24 = scalar_select %p1577_p8, 1, 0 }
  0x13   : > { %p1276_p9 = pneg %p1577_p8  ;;  %s1348_s4 = scalar_lea.hbm %s2702_s1, 192 }
  0x14   : > { %p1349_p12 = scmp.ne.s32.totalorder %s2702_s1, %s1348_s4  ;;  %p1355_p5 = scmp.lt.u32.totalorder %s1348_s4, %s2702_s1 }
  0x15   : > { %p1586_p11 = pnand %p1276_p9, %p1557_p1 }
  0x17   : > { %p1350_p13 = pneg %p1586_p11 }
  0x19   : > { %p1351_p0 = pnand %p1350_p13, %p1349_p12 }
  0x1b   : > { %p1352_p3 = pneg %p1351_p0 }
  0x1d   : > { %p1357_p7 = pnand %p1355_p5, %p1352_p3 }
  0x1f   : > { %1360 = shalt.err (!%p1357_p7)
}
  0x20   : > { %s1361_s9 = scalar_lea.vmem %s160_s26, 192  ;;  %p1369_p1 = scmp.lt.s32.totalorder %s160_s26, %s160_s26 }
  0x21   : > { %p1362_p9 = scmp.ne.s32.totalorder %s160_s26, %s1361_s9  ;;  %p1370_p4 = scmp.lt.s32.totalorder %s1361_s9, %s1361_s9 }
  0x23   : > { %p1364_p10 = pnand %p1362_p9, %p1350_p13  ;;  %p1371_p8 = por %p1370_p4, %p1369_p1 }
  0x25   : > { %p1365_p6 = pneg %p1364_p10 }
  0x27   : > { %p1372_p2 = pnand %p1371_p8, %p1365_p6 }
  0x29   : > { %1375 = shalt.err (!%p1372_p2)
}
  0x2a   : > { %s1495_s10 = smov 64   ;;  %s1496_s11 = smov 4  }
  0x2b   : > { %1279 = dma.hbm_to_vmem [thread:$0]  (!%p1586_p11), %s2702_s1, 192, %s160_s26, [#allocation6], %s1495_s10, %s1495_s10, %s1496_s11  }
  0x2c   : > { %p34_p1 = scmp.ge.s32.totalorder %s32_s28, 2  ;;  %s41_s25 = sadd.s32 1, %s1480_s14 }
  0x2d   : > { %p48_p2 = scmp.ne.s32.totalorder %s1480_s14, %s1476_s13  ;;  %p49_p4 = scmp.eq.s32.totalorder %s1492_s17, 0 }
  0x2e   : > { %s2730_s28 = smov (%p34_p1, %s32_s28), 0  ;;  %p2716_p8 = scmp.ne.s32.totalorder %s2710_s21, 0 }
  0x2f   : > { %p1613_p6 = por %p49_p4, %p48_p2  ;;  %s36_s27 = ssub.s32 %s1488_s16, %s2730_s28 }
  0x30   : > { %p1619_p10 = por %p2716_p8, %p48_p2  ;;  %p1289_p12 = scmp.lt.s32.totalorder %s1492_s17, 2 }
  0x31   : > { %p39_p11 = scmp.eq.s32.totalorder %s36_s27, 0  ;;  %s179_s26 = sand.u32 1, %s1480_s14  }
  0x32   : > { %s1253_s4 = sshll.u32 %s179_s26, 8  ;;  %s1266_s6 = sshll.u32 %s1488_s16, 12 }
  0x33   : > { %s1628_s5 = scalar_select %p39_p11, %s1480_s14, %s41_s25  }
  0x34   : > { %s1634_s9 = scalar_lea.hbm %s2701_s0, %s1266_s6  ;;  %s183_s21 = scalar_lea.vmem [#allocation2], %s1253_s4 }
  0x35   : > { %s191_s10 = sshll.u32 %s183_s21, 4  ;;  %p1640_p13 = pnand %p1289_p12, %p1613_p6  ;;  %s1636_s10 = int_to_ptr.vmem [resolvable:$true] %s191_s10 }
  0x36   : > { %s1644_s18 = scalar_lea.sflag [#allocation3], %s179_s26  ;;  %s1376_s19 = scalar_lea.hbm %s1634_s9, 4096 }
  0x37   : > { %p1377_p0 = scmp.ne.s32.totalorder %s1634_s9, %s1376_s19  ;;  %p1378_p3 = pneg %p1640_p13 }
  0x38   : > { %s1381_s29 = scalar_lea.hbm %s2701_s0, 8192  ;;  %p1382_p9 = scmp.lt.u32.totalorder %s1634_s9, %s2701_s0 }
  0x39   : > { %p1379_p5 = pnand %p1378_p3, %p1377_p0  ;;  %p1383_p1 = scmp.lt.u32.totalorder %s1381_s29, %s1376_s19 }
  0x3a   : > { %p1385_p4 = scmp.lt.u32.totalorder %s1376_s19, %s1634_s9 }
  0x3b   : > { %p1380_p7 = pneg %p1379_p5  ;;  %p1384_p2 = por %p1383_p1, %p1382_p9 }
  0x3d   : > { %p1386_p6 = por %p1385_p4, %p1384_p2 }
  0x3f   : > { %p1387_p8 = pnand %p1386_p6, %p1380_p7 }
  0x41   : > { %1390 = shalt.err (!%p1387_p8)
}
  0x42   : > { %s1391_s26 = scalar_lea.vmem %s1636_s10, 4096  ;;  %s1497_s7 = smov [#allocation2]  }
  0x43   : > { %p1392_p12 = scmp.ne.s32.totalorder %s1636_s10, %s1391_s26  ;;  %s1396_s8 = sshll.u32 %s1497_s7, 4  ;;  %s1397_s8 = int_to_ptr.vmem [resolvable:$false] %s1396_s8 }
  0x44   : > { %s1398_s21 = scalar_lea.vmem %s1397_s8, 8192  ;;  %p1399_p5 = scmp.lt.s32.totalorder %s1636_s10, %s1397_s8 }
  0x45   : > { %p1394_p11 = pnand %p1392_p12, %p1378_p3  ;;  %p1400_p9 = scmp.lt.s32.totalorder %s1398_s21, %s1391_s26 }
  0x47   : > { %p1395_p0 = pneg %p1394_p11  ;;  %p1401_p1 = por %p1400_p9, %p1399_p5 }
  0x49   : > { %p1402_p2 = pnand %p1401_p1, %p1395_p0 }
  0x4b   : > { %1405 = shalt.err (!%p1402_p2)
}
  0x4c   : > { %s1498_s19 = smov 128   ;;  %s1499_s25 = smov 8  }
  0x4d   : > { %1283 = dma.hbm_to_vmem [thread:$0]  (!%p1640_p13), %s1634_s9, 4096, %s1636_s10, %s1644_s18, %s1498_s19, %s1498_s19, %s1499_s25  }
  0x4e   : > { %p2719_p3 = scmp.ne.s32.totalorder %s2713_s24, 0 }
  0x4f   : > { %s1675_s27 = sand.u32 (!%p2719_p3), 1, %s1476_s13   ;;  %p2720_p7 = scmp.ne.s32.totalorder (!%p2719_p3), %s2711_s22, 0 }
  0x50   : > { %203 = sbr.rel (%p2719_p3) target bundleno = 304 (0x130), region = 32  ;;  %s1257_s29 = sshll.u32 (!%p2719_p3), %s1675_s27, 8 }
  0x51   : > { %s206_s4 = scalar_lea.sflag (!%p2719_p3), [#allocation3], %s1675_s27  ;;  %s1681_s6 = scalar_lea.vmem (!%p2719_p3), [#allocation2], %s1257_s29 }
  0x57   : > { %1459 = dma.done.wait (%p2720_p7), %s206_s4, 4096  }
  0x58   : > { %1461 = vsyncadd (%p2720_p7), %s206_s4, 4294963200  ;;  %p2721_p13 = scmp.ne.s32.totalorder %s2709_s20, 0 }
  0x5a   : > { %1463 = dma.done.wait (%p2721_p13), [#allocation6], 192  }
  0x5b   : > { %1465 = vsyncadd (%p2721_p13), [#allocation6], 4294967104  ;;  %v252_v0 = vlaneseq  ;;  %v242_v6 = vld [vmem:[#allocation5] sm:$0x7]  ;;  %v243_v7 = vld [vmem:[#allocation5 + $0x4] sm:$0x7] }
  0x5c   : > { %v244_v8 = vld [vmem:[#allocation5 + $0x8] sm:$0x7]  ;;  %v1702_v9 = vld [vmem:[%s1681_s6] sm:$0xff]  ;;  %v1716_v15 = vld [vmem:[%s1681_s6 + $0x10] sm:$0xff]  ;;  %s1805_s24 = scalar_lea.vmem [#allocation7], %s1257_s29  ;;  %s1267_s11 = sshll.u32 %s1484_s15, 12 }
  0x5d   : > { %v1691_v1 = vshrl.u32 %v252_v0, 7  ;;  %v1705_v10 = vld [vmem:[%s1681_s6 + $0x8] sm:$0xff]  ;;  %v1727_v20 = vld [vmem:[%s1681_s6 + $0x18] sm:$0xff]  ;;  %v1755_v36 = vld [vmem:[%s2703_s2] ss:$0 sm:$0xff]  ;;  %s1138_s18 = sshll.u32 %s1805_s24, 4  ;;  %s2649_s8 = scalar_lea.hbm %s2704_s3, %s1267_s11  ;;  %s2651_s18 = int_to_ptr.vmem [resolvable:$true] %s1138_s18 }
  0x5e   : > { %v1777_v60 = vld [vmem:[%s1681_s6 + $0x20] sm:$0xff]  ;;  %v1783_v0 = vld [vmem:[%s1681_s6 + $0x28] sm:$0xff]  ;;  %s1124_s15 = scalar_lea.sflag [#allocation4], %s1675_s27  ;;  %s1406_s21 = scalar_lea.vmem %s2651_s18, 4096 }
  0x5f   : > { %v293_v2 = vsub.s32 0, %v1691_v1  ;;  %v463_v3 = vsub.s32 1, %v1691_v1  ;;  %v633_v4 = vsub.s32 2, %v1691_v1  ;;  %v1697_v5 = vadd.s32 8, %v1691_v1  ;;  %p1407_p4 = scmp.ne.s32.totalorder %s2651_s18, %s1406_s21  ;;  %s1500_s19 = smov [#allocation7]  }
  0x60   : > { %vm865_vm0 = vcmp.lt.s32.totalorder %v1691_v1, 1  ;;  %vm255_vm1 = vcmp.gt.s32.totalorder %v1691_v1, 0  ;;  %vm994_vm2 = vcmp.lt.s32.totalorder %v1691_v1, 7  ;;  %s1410_s25 = sshll.u32 %s1500_s19, 4  ;;  %s1411_s25 = int_to_ptr.vmem [resolvable:$false] %s1410_s25 }
  0x61   : > { %v1707_v11 = vrot.slane %v242_v6, %v293_v2  ;;  %v1709_v12 = vrot.slane %v243_v7, %v293_v2  ;;  %v1711_v13 = vrot.slane %v244_v8, %v293_v2  ;;  %v1713_v14 = vrot.slane %v242_v6, %v463_v3  ;;  %p1408_p6 = pnand %p1407_p4, %p1619_p10  ;;  %s1412_s29 = scalar_lea.vmem %s1411_s25, 8192 }
  0x62   : > { %v1718_v16 = vrot.slane %v243_v7, %v463_v3  ;;  %v1720_v17 = vrot.slane %v244_v8, %v463_v3  ;;  %v1722_v18 = vrot.slane %v242_v6, %v633_v4  ;;  %v1724_v19 = vrot.slane %v243_v7, %v633_v4  ;;  %p1413_p12 = scmp.lt.s32.totalorder %s2651_s18, %s1411_s25  ;;  %p1414_p11 = scmp.lt.s32.totalorder %s1412_s29, %s1406_s21 }
  0x63   : > { %v295_v21 = vmul.f32 0.0, %v1707_v11  ;;  %v330_v22 = vmul.f32 %v1709_v12, %v1702_v9  ;;  %v331_v23 = vmul.f32 %v1709_v12, %v1705_v10  ;;  %v398_v24 = vmul.f32 %v1711_v13, %v1716_v15  ;;  %p1409_p8 = pneg %p1408_p6 }
  0x64   : > { %v399_v25 = vmul.f32 %v1711_v13, %v1727_v20  ;;  %v465_v26 = vmul.f32 0.0, %v1713_v14  ;;  %v500_v27 = vmul.f32 %v1718_v16, %v1702_v9  ;;  %v568_v28 = vmul.f32 %v1720_v17, %v1716_v15  ;;  %p1415_p0 = por %p1414_p11, %p1413_p12 }
  0x65   : > { %v362_v29 = vadd.f32 %v330_v22, %v295_v21  ;;  %v363_v30 = vadd.f32 %v331_v23, %v295_v21  ;;  %v635_v31 = vmul.f32 0.0, %v1722_v18  ;;  %v670_v32 = vmul.f32 %v1724_v19, %v1702_v9 }
  0x66   : > { %v532_v33 = vadd.f32 %v500_v27, %v465_v26  ;;  %v671_v34 = vmul.f32 %v1724_v19, %v1705_v10  ;;  %v1749_v35 = vrot.slane %v244_v8, %v633_v4  ;;  %vm258_vm3 = vcmp.lt.s32.totalorder %v1697_v5, 15  ;;  %p1416_p5 = pnand %p1415_p0, %p1409_p8 }
  0x67   : > { %v429_v37 = vadd.f32 %v398_v24, %v362_v29  ;;  %v430_v38 = vadd.f32 %v399_v25, %v363_v30  ;;  %v702_v39 = vadd.f32 %v670_v32, %v635_v31  ;;  %v501_v40 = vmul.f32 %v1718_v16, %v1705_v10 }
  0x68   : > { %v599_v41 = vadd.f32 %v568_v28, %v532_v33  ;;  %v703_v42 = vadd.f32 %v671_v34, %v635_v31  ;;  %v738_v43 = vmul.f32 %v1749_v35, %v1716_v15  ;;  %v739_v44 = vmul.f32 %v1749_v35, %v1727_v20 }
  0x69   : > { %v833_v45 = vrot.slane %v429_v37, 7  ;;  %v849_v46 = vrot.slane %v430_v38, 7  ;;  %v533_v47 = vadd.f32 %v501_v40, %v465_v26  ;;  %v569_v48 = vmul.f32 %v1720_v17, %v1727_v20 }
  0x6a   : > { %v769_v49 = vadd.f32 %v738_v43, %v702_v39  ;;  %v770_v50 = vadd.f32 %v739_v44, %v703_v42  ;;  %v801_v51 = vadd.f32 %v1755_v36, %v599_v41  ;;  %v296_v52 = vmul.f32 %v1707_v11, %v1702_v9 }
  0x6b   : > { %v882_v53 = vsel %vm865_vm0, %v849_v46, %v833_v45  ;;  %v600_v54 = vadd.f32 %v569_v48, %v533_v47  ;;  %v866_v55 = vsel %vm865_vm0, %v833_v45, %v849_v46  ;;  %v297_v56 = vmul.f32 %v1707_v11, %v1705_v10 }
  0x6c   : > { %v898_v57 = vsel %vm255_vm1, %v882_v53, 0.0  ;;  %v962_v58 = vrot.slane %v769_v49, 1  ;;  %v978_v59 = vrot.slane %v770_v50, 1  ;;  %v332_v61 = vmul.f32 %v1709_v12, %v1716_v15 }
  0x6d   : > { %v930_v62 = vadd.f32 %v898_v57, %v801_v51  ;;  %v802_v63 = vadd.f32 %v1755_v36, %v600_v54  ;;  %v333_v2 = vmul.f32 %v1709_v12, %v1727_v20  ;;  %v400_v3 = vmul.f32 %v1711_v13, %v1777_v60  ;;  %v1837_v54 = vld [vmem:[%s1681_s6 + $0x30] sm:$0xff] }
  0x6e   : > { %v995_v4 = vsel %vm994_vm2, %v962_v58, %v978_v59  ;;  %v1011_v6 = vsel %vm994_vm2, %v978_v59, %v962_v58  ;;  %v364_v7 = vadd.f32 %v332_v61, %v296_v52  ;;  %v401_v8 = vmul.f32 %v1711_v13, %v1783_v0 }
  0x6f   : > { %v1059_v21 = vadd.f32 %v995_v4, %v930_v62  ;;  %v931_v22 = vadd.f32 %v866_v55, %v802_v63  ;;  %v1028_v23 = vsel %vm258_vm3, %v1011_v6, 0.0  ;;  %v365_v24 = vadd.f32 %v333_v2, %v297_v56  ;;  %v1846_v62 = vld [vmem:[%s1681_s6 + $0x38] sm:$0xff] }
  0x70   : > { %v431_v25 = vadd.f32 %v400_v3, %v364_v7  ;;  %v466_v26 = vmul.f32 %v1713_v14, %v1702_v9  ;;  %v502_v27 = vmul.f32 %v1718_v16, %v1716_v15  ;;  %v570_v28 = vmul.f32 %v1720_v17, %v1777_v60 }
  0x71   : > { %1091 = vst [vmem:[%s1805_s24] sm:$0xff] %v1059_v21  ;;  %v1060_v29 = vadd.f32 %v1028_v23, %v931_v22  ;;  %v432_v30 = vadd.f32 %v401_v8, %v365_v24  ;;  %v636_v31 = vmul.f32 %v1722_v18, %v1702_v9  ;;  %v637_v32 = vmul.f32 %v1722_v18, %v1705_v10 }
  0x72   : > { %v534_v33 = vadd.f32 %v502_v27, %v466_v26  ;;  %v672_v34 = vmul.f32 %v1724_v19, %v1716_v15  ;;  %v673_v37 = vmul.f32 %v1724_v19, %v1727_v20  ;;  %v740_v38 = vmul.f32 %v1749_v35, %v1777_v60 }
  0x73   : > { %1092 = vst [vmem:[%s1805_s24 + $0x8] sm:$0xff] %v1060_v29  ;;  %v741_v39 = vmul.f32 %v1749_v35, %v1783_v0  ;;  %v834_v40 = vrot.slane %v431_v25, 7  ;;  %v850_v9 = vrot.slane %v432_v30, 7  ;;  %v467_v41 = vmul.f32 %v1713_v14, %v1705_v10 }
  0x74   : > { %v601_v42 = vadd.f32 %v570_v28, %v534_v33  ;;  %v704_v43 = vadd.f32 %v672_v34, %v636_v31  ;;  %v705_v44 = vadd.f32 %v673_v37, %v637_v32  ;;  %v503_v45 = vmul.f32 %v1718_v16, %v1727_v20 }
  0x75   : > { %v883_v46 = vsel %vm865_vm0, %v850_v9, %v834_v40  ;;  %v571_v47 = vmul.f32 %v1720_v17, %v1783_v0  ;;  %v867_v48 = vsel %vm865_vm0, %v834_v40, %v850_v9  ;;  %v298_v49 = vmul.f32 %v1707_v11, %v1716_v15 }
  0x76   : > { %v771_v10 = vadd.f32 %v740_v38, %v704_v43  ;;  %v772_v50 = vadd.f32 %v741_v39, %v705_v44  ;;  %v803_v51 = vadd.f32 %v1755_v36, %v601_v42  ;;  %v900_v52 = vsel %vm255_vm1, %v883_v46, 0.0 }
  0x77   : > { %v535_v53 = vadd.f32 %v503_v45, %v467_v41  ;;  %v299_v55 = vmul.f32 %v1707_v11, %v1727_v20  ;;  %v334_v56 = vmul.f32 %v1709_v12, %v1777_v60  ;;  %v335_v57 = vmul.f32 %v1709_v12, %v1783_v0 }
  0x78   : > { %v932_v58 = vadd.f32 %v900_v52, %v803_v51  ;;  %v963_v59 = vrot.slane %v771_v10, 1  ;;  %v979_v61 = vrot.slane %v772_v50, 1  ;;  %v402_v63 = vmul.f32 %v1711_v13, %v1837_v54 }
  0x79   : > { %v602_v2 = vadd.f32 %v571_v47, %v535_v53  ;;  %v366_v3 = vadd.f32 %v334_v56, %v298_v49  ;;  %v367_v4 = vadd.f32 %v335_v57, %v299_v55  ;;  %v403_v6 = vmul.f32 %v1711_v13, %v1846_v62  ;;  %v1897_v57 = vld [vmem:[%s1681_s6 + $0x40] sm:$0xff] }
  0x7a   : > { %v996_v7 = vsel %vm994_vm2, %v963_v59, %v979_v61  ;;  %v1012_v8 = vsel %vm994_vm2, %v979_v61, %v963_v59  ;;  %v468_v21 = vmul.f32 %v1713_v14, %v1716_v15  ;;  %v504_v22 = vmul.f32 %v1718_v16, %v1777_v60 }
  0x7b   : > { %v1061_v23 = vadd.f32 %v996_v7, %v932_v58  ;;  %v804_v24 = vadd.f32 %v1755_v36, %v602_v2  ;;  %v1030_v25 = vsel %vm258_vm3, %v1012_v8, 0.0  ;;  %v433_v26 = vadd.f32 %v402_v63, %v366_v3  ;;  %v1900_v58 = vld [vmem:[%s1681_s6 + $0x48] sm:$0xff] }
  0x7c   : > { %v434_v27 = vadd.f32 %v403_v6, %v367_v4  ;;  %v536_v28 = vadd.f32 %v504_v22, %v468_v21  ;;  %v572_v29 = vmul.f32 %v1720_v17, %v1837_v54  ;;  %v638_v30 = vmul.f32 %v1722_v18, %v1716_v15 }
  0x7d   : > { %1093 = vst [vmem:[%s1805_s24 + $0x10] sm:$0xff] %v1061_v23  ;;  %v933_v31 = vadd.f32 %v867_v48, %v804_v24  ;;  %v639_v32 = vmul.f32 %v1722_v18, %v1727_v20  ;;  %v674_v33 = vmul.f32 %v1724_v19, %v1777_v60  ;;  %v675_v34 = vmul.f32 %v1724_v19, %v1783_v0 }
  0x7e   : > { %v603_v37 = vadd.f32 %v572_v29, %v536_v28  ;;  %v742_v38 = vmul.f32 %v1749_v35, %v1837_v54  ;;  %v743_v39 = vmul.f32 %v1749_v35, %v1846_v62  ;;  %v835_v15 = vrot.slane %v433_v26, 7 }
  0x7f   : > { %v1062_v40 = vadd.f32 %v1030_v25, %v933_v31  ;;  %v706_v9 = vadd.f32 %v674_v33, %v638_v30  ;;  %v707_v41 = vadd.f32 %v675_v34, %v639_v32  ;;  %v851_v42 = vrot.slane %v434_v27, 7 }
  0x80   : > { %v805_v43 = vadd.f32 %v1755_v36, %v603_v37  ;;  %v469_v44 = vmul.f32 %v1713_v14, %v1727_v20  ;;  %v505_v45 = vmul.f32 %v1718_v16, %v1783_v0  ;;  %v573_v46 = vmul.f32 %v1720_v17, %v1846_v62 }
  0x81   : > { %1094 = vst [vmem:[%s1805_s24 + $0x18] sm:$0xff] %v1062_v40  ;;  %v773_v47 = vadd.f32 %v742_v38, %v706_v9  ;;  %v774_v48 = vadd.f32 %v743_v39, %v707_v41  ;;  %v884_v49 = vsel %vm865_vm0, %v851_v42, %v835_v15  ;;  %v868_v10 = vsel %vm865_vm0, %v835_v15, %v851_v42 }
  0x82   : > { %v902_v50 = vsel %vm255_vm1, %v884_v49, 0.0  ;;  %v537_v20 = vadd.f32 %v505_v45, %v469_v44  ;;  %v300_v51 = vmul.f32 %v1707_v11, %v1777_v60  ;;  %v301_v52 = vmul.f32 %v1707_v11, %v1783_v0 }
  0x83   : > { %v934_v53 = vadd.f32 %v902_v50, %v805_v43  ;;  %v964_v55 = vrot.slane %v773_v47, 1  ;;  %v980_v56 = vrot.slane %v774_v48, 1  ;;  %v336_v59 = vmul.f32 %v1709_v12, %v1837_v54 }
  0x84   : > { %v604_v61 = vadd.f32 %v573_v46, %v537_v20  ;;  %v337_v63 = vmul.f32 %v1709_v12, %v1846_v62  ;;  %v404_v2 = vmul.f32 %v1711_v13, %v1897_v57  ;;  %v405_v3 = vmul.f32 %v1711_v13, %v1900_v58 }
  0x85   : > { %v997_v4 = vsel %vm994_vm2, %v964_v55, %v980_v56  ;;  %v1013_v6 = vsel %vm994_vm2, %v980_v56, %v964_v55  ;;  %v368_v7 = vadd.f32 %v336_v59, %v300_v51  ;;  %v470_v8 = vmul.f32 %v1713_v14, %v1777_v60  ;;  %v1957_v59 = vld [vmem:[%s1681_s6 + $0x50] sm:$0xff] }
  0x86   : > { %v1063_v21 = vadd.f32 %v997_v4, %v934_v53  ;;  %v806_v22 = vadd.f32 %v1755_v36, %v604_v61  ;;  %v1032_v23 = vsel %vm258_vm3, %v1013_v6, 0.0  ;;  %v369_v24 = vadd.f32 %v337_v63, %v301_v52  ;;  %v1960_v61 = vld [vmem:[%s1681_s6 + $0x58] sm:$0xff] }
  0x87   : > { %v435_v25 = vadd.f32 %v404_v2, %v368_v7  ;;  %v506_v26 = vmul.f32 %v1718_v16, %v1837_v54  ;;  %v574_v27 = vmul.f32 %v1720_v17, %v1897_v57  ;;  %v640_v28 = vmul.f32 %v1722_v18, %v1777_v60 }
  0x88   : > { %1095 = vst [vmem:[%s1805_s24 + $0x20] sm:$0xff] %v1063_v21  ;;  %v935_v29 = vadd.f32 %v868_v10, %v806_v22  ;;  %v436_v30 = vadd.f32 %v405_v3, %v369_v24  ;;  %v641_v31 = vmul.f32 %v1722_v18, %v1783_v0  ;;  %v676_v32 = vmul.f32 %v1724_v19, %v1837_v54 }
  0x89   : > { %v538_v33 = vadd.f32 %v506_v26, %v470_v8  ;;  %v677_v34 = vmul.f32 %v1724_v19, %v1846_v62  ;;  %v744_v37 = vmul.f32 %v1749_v35, %v1897_v57  ;;  %v745_v60 = vmul.f32 %v1749_v35, %v1900_v58 }
  0x8a   : > { %v1064_v38 = vadd.f32 %v1032_v23, %v935_v29  ;;  %v708_v39 = vadd.f32 %v676_v32, %v640_v28  ;;  %v836_v15 = vrot.slane %v435_v25, 7  ;;  %v852_v40 = vrot.slane %v436_v30, 7 }
  0x8b   : > { %v605_v9 = vadd.f32 %v574_v27, %v538_v33  ;;  %v709_v41 = vadd.f32 %v677_v34, %v641_v31  ;;  %v471_v42 = vmul.f32 %v1713_v14, %v1783_v0  ;;  %v507_v43 = vmul.f32 %v1718_v16, %v1846_v62 }
  0x8c   : > { %1096 = vst [vmem:[%s1805_s24 + $0x28] sm:$0xff] %v1064_v38  ;;  %v775_v44 = vadd.f32 %v744_v37, %v708_v39  ;;  %v885_v45 = vsel %vm865_vm0, %v852_v40, %v836_v15  ;;  %v575_v46 = vmul.f32 %v1720_v17, %v1900_v58  ;;  %v869_v47 = vsel %vm865_vm0, %v836_v15, %v852_v40 }
  0x8d   : > { %v776_v48 = vadd.f32 %v745_v60, %v709_v41  ;;  %v807_v49 = vadd.f32 %v1755_v36, %v605_v9  ;;  %v904_v0 = vsel %vm255_vm1, %v885_v45, 0.0  ;;  %v539_v10 = vadd.f32 %v507_v43, %v471_v42 }
  0x8e   : > { %v965_v50 = vrot.slane %v775_v44, 1  ;;  %v302_v20 = vmul.f32 %v1707_v11, %v1837_v54  ;;  %v303_v51 = vmul.f32 %v1707_v11, %v1846_v62  ;;  %v338_v52 = vmul.f32 %v1709_v12, %v1897_v57 }
  0x8f   : > { %v936_v53 = vadd.f32 %v904_v0, %v807_v49  ;;  %v981_v55 = vrot.slane %v776_v48, 1  ;;  %v606_v56 = vadd.f32 %v575_v46, %v539_v10  ;;  %v339_v63 = vmul.f32 %v1709_v12, %v1900_v58 }
  0x90   : > { %v370_v2 = vadd.f32 %v338_v52, %v302_v20  ;;  %v406_v3 = vmul.f32 %v1711_v13, %v1957_v59  ;;  %v407_v4 = vmul.f32 %v1711_v13, %v1960_v61  ;;  %v472_v6 = vmul.f32 %v1713_v14, %v1837_v54  ;;  %v2013_v52 = vld [vmem:[%s1681_s6 + $0x60] sm:$0xff] }
  0x91   : > { %v998_v7 = vsel %vm994_vm2, %v965_v50, %v981_v55  ;;  %v808_v8 = vadd.f32 %v1755_v36, %v606_v56  ;;  %v1014_v21 = vsel %vm994_vm2, %v981_v55, %v965_v50  ;;  %v371_v22 = vadd.f32 %v339_v63, %v303_v51 }
  0x92   : > { %v1065_v23 = vadd.f32 %v998_v7, %v936_v53  ;;  %v1034_v24 = vsel %vm258_vm3, %v1014_v21, 0.0  ;;  %v437_v25 = vadd.f32 %v406_v3, %v370_v2  ;;  %v508_v26 = vmul.f32 %v1718_v16, %v1897_v57  ;;  %v2016_v53 = vld [vmem:[%s1681_s6 + $0x68] sm:$0xff] }
  0x93   : > { %v937_v27 = vadd.f32 %v869_v47, %v808_v8  ;;  %v438_v28 = vadd.f32 %v407_v4, %v371_v22  ;;  %v576_v29 = vmul.f32 %v1720_v17, %v1957_v59  ;;  %v642_v30 = vmul.f32 %v1722_v18, %v1837_v54 }
  0x94   : > { %1097 = vst [vmem:[%s1805_s24 + $0x30] sm:$0xff] %v1065_v23  ;;  %v540_v31 = vadd.f32 %v508_v26, %v472_v6  ;;  %v643_v32 = vmul.f32 %v1722_v18, %v1846_v62  ;;  %v678_v33 = vmul.f32 %v1724_v19, %v1897_v57  ;;  %v679_v34 = vmul.f32 %v1724_v19, %v1900_v58 }
  0x95   : > { %v1066_v37 = vadd.f32 %v1034_v24, %v937_v27  ;;  %v746_v60 = vmul.f32 %v1749_v35, %v1957_v59  ;;  %v747_v38 = vmul.f32 %v1749_v35, %v1960_v61  ;;  %v837_v39 = vrot.slane %v437_v25, 7 }
  0x96   : > { %v607_v54 = vadd.f32 %v576_v29, %v540_v31  ;;  %v710_v15 = vadd.f32 %v678_v33, %v642_v30  ;;  %v711_v40 = vadd.f32 %v679_v34, %v643_v32  ;;  %v853_v9 = vrot.slane %v438_v28, 7 }
  0x97   : > { %1098 = vst [vmem:[%s1805_s24 + $0x38] sm:$0xff] %v1066_v37  ;;  %v473_v41 = vmul.f32 %v1713_v14, %v1846_v62  ;;  %v509_v42 = vmul.f32 %v1718_v16, %v1900_v58  ;;  %v577_v43 = vmul.f32 %v1720_v17, %v1960_v61  ;;  %v304_v44 = vmul.f32 %v1707_v11, %v1897_v57 }
  0x98   : > { %v777_v45 = vadd.f32 %v746_v60, %v710_v15  ;;  %v778_v46 = vadd.f32 %v747_v38, %v711_v40  ;;  %v809_v47 = vadd.f32 %v1755_v36, %v607_v54  ;;  %v886_v48 = vsel %vm865_vm0, %v853_v9, %v837_v39 }
  0x99   : > { %v906_v62 = vsel %vm255_vm1, %v886_v48, 0.0  ;;  %v541_v49 = vadd.f32 %v509_v42, %v473_v41  ;;  %v870_v0 = vsel %vm865_vm0, %v837_v39, %v853_v9  ;;  %v305_v10 = vmul.f32 %v1707_v11, %v1900_v58 }
  0x9a   : > { %v938_v50 = vadd.f32 %v906_v62, %v809_v47  ;;  %v966_v20 = vrot.slane %v777_v45, 1  ;;  %v982_v51 = vrot.slane %v778_v46, 1  ;;  %v340_v55 = vmul.f32 %v1709_v12, %v1957_v59 }
  0x9b   : > { %v608_v56 = vadd.f32 %v577_v43, %v541_v49  ;;  %v341_v63 = vmul.f32 %v1709_v12, %v1960_v61  ;;  %v408_v2 = vmul.f32 %v1711_v13, %v2013_v52  ;;  %v409_v3 = vmul.f32 %v1711_v13, %v2016_v53 }
  0x9c   : > { %v999_v4 = vsel %vm994_vm2, %v966_v20, %v982_v51  ;;  %v1015_v6 = vsel %vm994_vm2, %v982_v51, %v966_v20  ;;  %v372_v7 = vadd.f32 %v340_v55, %v304_v44  ;;  %v474_v8 = vmul.f32 %v1713_v14, %v1897_v57  ;;  %v2073_v55 = vld [vmem:[%s1681_s6 + $0x70] sm:$0xff] }
  0x9d   : > { %v1067_v21 = vadd.f32 %v999_v4, %v938_v50  ;;  %v810_v22 = vadd.f32 %v1755_v36, %v608_v56  ;;  %v1036_v23 = vsel %vm258_vm3, %v1015_v6, 0.0  ;;  %v373_v24 = vadd.f32 %v341_v63, %v305_v10  ;;  %v2076_v56 = vld [vmem:[%s1681_s6 + $0x78] sm:$0xff] }
  0x9e   : > { %v439_v25 = vadd.f32 %v408_v2, %v372_v7  ;;  %v510_v26 = vmul.f32 %v1718_v16, %v1957_v59  ;;  %v578_v27 = vmul.f32 %v1720_v17, %v2013_v52  ;;  %v644_v28 = vmul.f32 %v1722_v18, %v1897_v57 }
  0x9f   : > { %1099 = vst [vmem:[%s1805_s24 + $0x40] sm:$0xff] %v1067_v21  ;;  %v939_v29 = vadd.f32 %v870_v0, %v810_v22  ;;  %v440_v30 = vadd.f32 %v409_v3, %v373_v24  ;;  %v645_v31 = vmul.f32 %v1722_v18, %v1900_v58  ;;  %v680_v32 = vmul.f32 %v1724_v19, %v1957_v59 }
  0xa0   : > { %v542_v33 = vadd.f32 %v510_v26, %v474_v8  ;;  %v681_v34 = vmul.f32 %v1724_v19, %v1960_v61  ;;  %v748_v37 = vmul.f32 %v1749_v35, %v2013_v52  ;;  %v749_v57 = vmul.f32 %v1749_v35, %v2016_v53 }
  0xa1   : > { %v1068_v60 = vadd.f32 %v1036_v23, %v939_v29  ;;  %v712_v38 = vadd.f32 %v680_v32, %v644_v28  ;;  %v838_v39 = vrot.slane %v439_v25, 7  ;;  %v854_v54 = vrot.slane %v440_v30, 7 }
  0xa2   : > { %v609_v15 = vadd.f32 %v578_v27, %v542_v33  ;;  %v713_v40 = vadd.f32 %v681_v34, %v645_v31  ;;  %v475_v9 = vmul.f32 %v1713_v14, %v1900_v58  ;;  %v511_v41 = vmul.f32 %v1718_v16, %v1960_v61 }
  0xa3   : > { %1100 = vst [vmem:[%s1805_s24 + $0x48] sm:$0xff] %v1068_v60  ;;  %v779_v42 = vadd.f32 %v748_v37, %v712_v38  ;;  %v887_v43 = vsel %vm865_vm0, %v854_v54, %v838_v39  ;;  %v579_v44 = vmul.f32 %v1720_v17, %v2016_v53  ;;  %v871_v45 = vsel %vm865_vm0, %v838_v39, %v854_v54 }
  0xa4   : > { %v780_v46 = vadd.f32 %v749_v57, %v713_v40  ;;  %v811_v47 = vadd.f32 %v1755_v36, %v609_v15  ;;  %v908_v58 = vsel %vm255_vm1, %v887_v43, 0.0  ;;  %v543_v48 = vadd.f32 %v511_v41, %v475_v9 }
  0xa5   : > { %v967_v62 = vrot.slane %v779_v42, 1  ;;  %v306_v49 = vmul.f32 %v1707_v11, %v1957_v59  ;;  %v307_v0 = vmul.f32 %v1707_v11, %v1960_v61  ;;  %v342_v10 = vmul.f32 %v1709_v12, %v2013_v52 }
  0xa6   : > { %v940_v50 = vadd.f32 %v908_v58, %v811_v47  ;;  %v983_v20 = vrot.slane %v780_v46, 1  ;;  %v610_v51 = vadd.f32 %v579_v44, %v543_v48  ;;  %v343_v63 = vmul.f32 %v1709_v12, %v2016_v53 }
  0xa7   : > { %v374_v2 = vadd.f32 %v342_v10, %v306_v49  ;;  %v410_v3 = vmul.f32 %v1711_v13, %v2073_v55  ;;  %v411_v4 = vmul.f32 %v1711_v13, %v2076_v56  ;;  %v476_v6 = vmul.f32 %v1713_v14, %v1957_v59  ;;  %v2129_v10 = vld [vmem:[%s1681_s6 + $0x80] sm:$0xff] }
  0xa8   : > { %v1000_v7 = vsel %vm994_vm2, %v967_v62, %v983_v20  ;;  %v812_v8 = vadd.f32 %v1755_v36, %v610_v51  ;;  %v1016_v21 = vsel %vm994_vm2, %v983_v20, %v967_v62  ;;  %v375_v22 = vadd.f32 %v343_v63, %v307_v0 }
  0xa9   : > { %v1069_v23 = vadd.f32 %v1000_v7, %v940_v50  ;;  %v1038_v24 = vsel %vm258_vm3, %v1016_v21, 0.0  ;;  %v441_v25 = vadd.f32 %v410_v3, %v374_v2  ;;  %v512_v26 = vmul.f32 %v1718_v16, %v2013_v52  ;;  %v2132_v50 = vld [vmem:[%s1681_s6 + $0x88] sm:$0xff] }
  0xaa   : > { %v941_v27 = vadd.f32 %v871_v45, %v812_v8  ;;  %v442_v28 = vadd.f32 %v411_v4, %v375_v22  ;;  %v580_v29 = vmul.f32 %v1720_v17, %v2073_v55  ;;  %v646_v30 = vmul.f32 %v1722_v18, %v1957_v59 }
  0xab   : > { %1101 = vst [vmem:[%s1805_s24 + $0x50] sm:$0xff] %v1069_v23  ;;  %v544_v31 = vadd.f32 %v512_v26, %v476_v6  ;;  %v647_v32 = vmul.f32 %v1722_v18, %v1960_v61  ;;  %v682_v33 = vmul.f32 %v1724_v19, %v2013_v52  ;;  %v683_v34 = vmul.f32 %v1724_v19, %v2016_v53 }
  0xac   : > { %v1070_v37 = vadd.f32 %v1038_v24, %v941_v27  ;;  %v750_v57 = vmul.f32 %v1749_v35, %v2073_v55  ;;  %v751_v60 = vmul.f32 %v1749_v35, %v2076_v56  ;;  %v839_v38 = vrot.slane %v441_v25, 7 }
  0xad   : > { %v611_v59 = vadd.f32 %v580_v29, %v544_v31  ;;  %v714_v39 = vadd.f32 %v682_v33, %v646_v30  ;;  %v715_v54 = vadd.f32 %v683_v34, %v647_v32  ;;  %v855_v15 = vrot.slane %v442_v28, 7 }
  0xae   : > { %1102 = vst [vmem:[%s1805_s24 + $0x58] sm:$0xff] %v1070_v37  ;;  %v477_v40 = vmul.f32 %v1713_v14, %v1960_v61  ;;  %v513_v9 = vmul.f32 %v1718_v16, %v2016_v53  ;;  %v581_v41 = vmul.f32 %v1720_v17, %v2076_v56  ;;  %v308_v42 = vmul.f32 %v1707_v11, %v2013_v52 }
  0xaf   : > { %v781_v43 = vadd.f32 %v750_v57, %v714_v39  ;;  %v782_v44 = vadd.f32 %v751_v60, %v715_v54  ;;  %v813_v45 = vadd.f32 %v1755_v36, %v611_v59  ;;  %v888_v46 = vsel %vm865_vm0, %v855_v15, %v839_v38 }
  0xb0   : > { %v910_v61 = vsel %vm255_vm1, %v888_v46, 0.0  ;;  %v545_v47 = vadd.f32 %v513_v9, %v477_v40  ;;  %v872_v58 = vsel %vm865_vm0, %v839_v38, %v855_v15  ;;  %v309_v48 = vmul.f32 %v1707_v11, %v2016_v53 }
  0xb1   : > { %v942_v62 = vadd.f32 %v910_v61, %v813_v45  ;;  %v968_v49 = vrot.slane %v781_v43, 1  ;;  %v984_v0 = vrot.slane %v782_v44, 1  ;;  %v344_v20 = vmul.f32 %v1709_v12, %v2073_v55 }
  0xb2   : > { %v612_v51 = vadd.f32 %v581_v41, %v545_v47  ;;  %v345_v63 = vmul.f32 %v1709_v12, %v2076_v56  ;;  %v412_v2 = vmul.f32 %v1711_v13, %v2129_v10  ;;  %v413_v3 = vmul.f32 %v1711_v13, %v2132_v50 }
  0xb3   : > { %v1001_v4 = vsel %vm994_vm2, %v968_v49, %v984_v0  ;;  %v1017_v6 = vsel %vm994_vm2, %v984_v0, %v968_v49  ;;  %v376_v7 = vadd.f32 %v344_v20, %v308_v42  ;;  %v478_v8 = vmul.f32 %v1713_v14, %v2013_v52  ;;  %v2189_v20 = vld [vmem:[%s1681_s6 + $0x90] sm:$0xff] }
  0xb4   : > { %v1071_v21 = vadd.f32 %v1001_v4, %v942_v62  ;;  %v814_v22 = vadd.f32 %v1755_v36, %v612_v51  ;;  %v1040_v23 = vsel %vm258_vm3, %v1017_v6, 0.0  ;;  %v377_v24 = vadd.f32 %v345_v63, %v309_v48  ;;  %v2192_v51 = vld [vmem:[%s1681_s6 + $0x98] sm:$0xff] }
  0xb5   : > { %v443_v25 = vadd.f32 %v412_v2, %v376_v7  ;;  %v514_v26 = vmul.f32 %v1718_v16, %v2073_v55  ;;  %v582_v27 = vmul.f32 %v1720_v17, %v2129_v10  ;;  %v648_v28 = vmul.f32 %v1722_v18, %v2013_v52 }
  0xb6   : > { %1103 = vst [vmem:[%s1805_s24 + $0x60] sm:$0xff] %v1071_v21  ;;  %v943_v29 = vadd.f32 %v872_v58, %v814_v22  ;;  %v444_v30 = vadd.f32 %v413_v3, %v377_v24  ;;  %v649_v31 = vmul.f32 %v1722_v18, %v2016_v53  ;;  %v684_v32 = vmul.f32 %v1724_v19, %v2073_v55 }
  0xb7   : > { %v546_v33 = vadd.f32 %v514_v26, %v478_v8  ;;  %v685_v34 = vmul.f32 %v1724_v19, %v2076_v56  ;;  %v752_v37 = vmul.f32 %v1749_v35, %v2129_v10  ;;  %v753_v52 = vmul.f32 %v1749_v35, %v2132_v50 }
  0xb8   : > { %v1072_v57 = vadd.f32 %v1040_v23, %v943_v29  ;;  %v716_v60 = vadd.f32 %v684_v32, %v648_v28  ;;  %v840_v38 = vrot.slane %v443_v25, 7  ;;  %v856_v59 = vrot.slane %v444_v30, 7 }
  0xb9   : > { %v613_v39 = vadd.f32 %v582_v27, %v546_v33  ;;  %v717_v54 = vadd.f32 %v685_v34, %v649_v31  ;;  %v479_v15 = vmul.f32 %v1713_v14, %v2016_v53  ;;  %v515_v40 = vmul.f32 %v1718_v16, %v2076_v56 }
  0xba   : > { %1104 = vst [vmem:[%s1805_s24 + $0x68] sm:$0xff] %v1072_v57  ;;  %v783_v9 = vadd.f32 %v752_v37, %v716_v60  ;;  %v889_v41 = vsel %vm865_vm0, %v856_v59, %v840_v38  ;;  %v583_v42 = vmul.f32 %v1720_v17, %v2132_v50  ;;  %v873_v43 = vsel %vm865_vm0, %v840_v38, %v856_v59 }
  0xbb   : > { %v784_v44 = vadd.f32 %v753_v52, %v717_v54  ;;  %v815_v45 = vadd.f32 %v1755_v36, %v613_v39  ;;  %v912_v53 = vsel %vm255_vm1, %v889_v41, 0.0  ;;  %v547_v46 = vadd.f32 %v515_v40, %v479_v15 }
  0xbc   : > { %v969_v61 = vrot.slane %v783_v9, 1  ;;  %v310_v47 = vmul.f32 %v1707_v11, %v2073_v55  ;;  %v311_v58 = vmul.f32 %v1707_v11, %v2076_v56  ;;  %v346_v48 = vmul.f32 %v1709_v12, %v2129_v10 }
  0xbd   : > { %v944_v62 = vadd.f32 %v912_v53, %v815_v45  ;;  %v985_v49 = vrot.slane %v784_v44, 1  ;;  %v614_v0 = vadd.f32 %v583_v42, %v547_v46  ;;  %v347_v63 = vmul.f32 %v1709_v12, %v2132_v50 }
  0xbe   : > { %v378_v2 = vadd.f32 %v346_v48, %v310_v47  ;;  %v414_v3 = vmul.f32 %v1711_v13, %v2189_v20  ;;  %v415_v4 = vmul.f32 %v1711_v13, %v2192_v51  ;;  %v480_v6 = vmul.f32 %v1713_v14, %v2073_v55  ;;  %v2245_v48 = vld [vmem:[%s1681_s6 + $0xa0] sm:$0xff] }
  0xbf   : > { %v1002_v7 = vsel %vm994_vm2, %v969_v61, %v985_v49  ;;  %v816_v8 = vadd.f32 %v1755_v36, %v614_v0  ;;  %v1018_v21 = vsel %vm994_vm2, %v985_v49, %v969_v61  ;;  %v379_v22 = vadd.f32 %v347_v63, %v311_v58 }
  0xc0   : > { %v1073_v23 = vadd.f32 %v1002_v7, %v944_v62  ;;  %v1042_v24 = vsel %vm258_vm3, %v1018_v21, 0.0  ;;  %v445_v25 = vadd.f32 %v414_v3, %v378_v2  ;;  %v516_v26 = vmul.f32 %v1718_v16, %v2129_v10  ;;  %v2248_v62 = vld [vmem:[%s1681_s6 + $0xa8] sm:$0xff] }
  0xc1   : > { %v945_v27 = vadd.f32 %v873_v43, %v816_v8  ;;  %v446_v28 = vadd.f32 %v415_v4, %v379_v22  ;;  %v584_v29 = vmul.f32 %v1720_v17, %v2189_v20  ;;  %v650_v30 = vmul.f32 %v1722_v18, %v2073_v55 }
  0xc2   : > { %1105 = vst [vmem:[%s1805_s24 + $0x70] sm:$0xff] %v1073_v23  ;;  %v548_v31 = vadd.f32 %v516_v26, %v480_v6  ;;  %v651_v32 = vmul.f32 %v1722_v18, %v2076_v56  ;;  %v686_v33 = vmul.f32 %v1724_v19, %v2129_v10  ;;  %v687_v34 = vmul.f32 %v1724_v19, %v2132_v50 }
  0xc3   : > { %v1074_v37 = vadd.f32 %v1042_v24, %v945_v27  ;;  %v754_v52 = vmul.f32 %v1749_v35, %v2189_v20  ;;  %v755_v57 = vmul.f32 %v1749_v35, %v2192_v51  ;;  %v841_v60 = vrot.slane %v445_v25, 7 }
  0xc4   : > { %v615_v55 = vadd.f32 %v584_v29, %v548_v31  ;;  %v718_v38 = vadd.f32 %v686_v33, %v650_v30  ;;  %v719_v59 = vadd.f32 %v687_v34, %v651_v32  ;;  %v857_v39 = vrot.slane %v446_v28, 7 }
  0xc5   : > { %1106 = vst [vmem:[%s1805_s24 + $0x78] sm:$0xff] %v1074_v37  ;;  %v481_v54 = vmul.f32 %v1713_v14, %v2076_v56  ;;  %v517_v15 = vmul.f32 %v1718_v16, %v2132_v50  ;;  %v585_v40 = vmul.f32 %v1720_v17, %v2192_v51  ;;  %v312_v9 = vmul.f32 %v1707_v11, %v2129_v10 }
  0xc6   : > { %v785_v41 = vadd.f32 %v754_v52, %v718_v38  ;;  %v786_v42 = vadd.f32 %v755_v57, %v719_v59  ;;  %v817_v43 = vadd.f32 %v1755_v36, %v615_v55  ;;  %v890_v44 = vsel %vm865_vm0, %v857_v39, %v841_v60 }
  0xc7   : > { %v914_v56 = vsel %vm255_vm1, %v890_v44, 0.0  ;;  %v549_v45 = vadd.f32 %v517_v15, %v481_v54  ;;  %v874_v53 = vsel %vm865_vm0, %v841_v60, %v857_v39  ;;  %v313_v46 = vmul.f32 %v1707_v11, %v2132_v50 }
  0xc8   : > { %v946_v61 = vadd.f32 %v914_v56, %v817_v43  ;;  %v970_v47 = vrot.slane %v785_v41, 1  ;;  %v986_v58 = vrot.slane %v786_v42, 1  ;;  %v348_v49 = vmul.f32 %v1709_v12, %v2189_v20 }
  0xc9   : > { %v616_v0 = vadd.f32 %v585_v40, %v549_v45  ;;  %v349_v63 = vmul.f32 %v1709_v12, %v2192_v51  ;;  %v416_v2 = vmul.f32 %v1711_v13, %v2245_v48  ;;  %v417_v3 = vmul.f32 %v1711_v13, %v2248_v62 }
  0xca   : > { %v1003_v4 = vsel %vm994_vm2, %v970_v47, %v986_v58  ;;  %v1019_v6 = vsel %vm994_vm2, %v986_v58, %v970_v47  ;;  %v380_v7 = vadd.f32 %v348_v49, %v312_v9  ;;  %v482_v8 = vmul.f32 %v1713_v14, %v2129_v10  ;;  %v2305_v49 = vld [vmem:[%s1681_s6 + $0xb0] sm:$0xff] }
  0xcb   : > { %v1075_v21 = vadd.f32 %v1003_v4, %v946_v61  ;;  %v818_v22 = vadd.f32 %v1755_v36, %v616_v0  ;;  %v1044_v23 = vsel %vm258_vm3, %v1019_v6, 0.0  ;;  %v381_v24 = vadd.f32 %v349_v63, %v313_v46  ;;  %v2308_v0 = vld [vmem:[%s1681_s6 + $0xb8] sm:$0xff] }
  0xcc   : > { %v447_v25 = vadd.f32 %v416_v2, %v380_v7  ;;  %v518_v26 = vmul.f32 %v1718_v16, %v2189_v20  ;;  %v586_v27 = vmul.f32 %v1720_v17, %v2245_v48  ;;  %v652_v28 = vmul.f32 %v1722_v18, %v2129_v10 }
  0xcd   : > { %1107 = vst [vmem:[%s1805_s24 + $0x80] sm:$0xff] %v1075_v21  ;;  %v947_v29 = vadd.f32 %v874_v53, %v818_v22  ;;  %v448_v30 = vadd.f32 %v417_v3, %v381_v24  ;;  %v653_v31 = vmul.f32 %v1722_v18, %v2132_v50  ;;  %v688_v32 = vmul.f32 %v1724_v19, %v2189_v20 }
  0xce   : > { %v550_v33 = vadd.f32 %v518_v26, %v482_v8  ;;  %v689_v34 = vmul.f32 %v1724_v19, %v2192_v51  ;;  %v756_v37 = vmul.f32 %v1749_v35, %v2245_v48  ;;  %v757_v10 = vmul.f32 %v1749_v35, %v2248_v62 }
  0xcf   : > { %v1076_v52 = vadd.f32 %v1044_v23, %v947_v29  ;;  %v720_v57 = vadd.f32 %v688_v32, %v652_v28  ;;  %v842_v60 = vrot.slane %v447_v25, 7  ;;  %v858_v55 = vrot.slane %v448_v30, 7 }
  0xd0   : > { %v617_v38 = vadd.f32 %v586_v27, %v550_v33  ;;  %v721_v59 = vadd.f32 %v689_v34, %v653_v31  ;;  %v483_v39 = vmul.f32 %v1713_v14, %v2132_v50  ;;  %v519_v54 = vmul.f32 %v1718_v16, %v2192_v51 }
  0xd1   : > { %1108 = vst [vmem:[%s1805_s24 + $0x88] sm:$0xff] %v1076_v52  ;;  %v787_v15 = vadd.f32 %v756_v37, %v720_v57  ;;  %v891_v40 = vsel %vm865_vm0, %v858_v55, %v842_v60  ;;  %v587_v9 = vmul.f32 %v1720_v17, %v2248_v62  ;;  %v875_v41 = vsel %vm865_vm0, %v842_v60, %v858_v55 }
  0xd2   : > { %v788_v42 = vadd.f32 %v757_v10, %v721_v59  ;;  %v819_v43 = vadd.f32 %v1755_v36, %v617_v38  ;;  %v916_v50 = vsel %vm255_vm1, %v891_v40, 0.0  ;;  %v551_v44 = vadd.f32 %v519_v54, %v483_v39 }
  0xd3   : > { %v971_v56 = vrot.slane %v787_v15, 1  ;;  %v314_v45 = vmul.f32 %v1707_v11, %v2189_v20  ;;  %v315_v53 = vmul.f32 %v1707_v11, %v2192_v51  ;;  %v350_v46 = vmul.f32 %v1709_v12, %v2245_v48 }
  0xd4   : > { %v948_v61 = vadd.f32 %v916_v50, %v819_v43  ;;  %v987_v47 = vrot.slane %v788_v42, 1  ;;  %v618_v58 = vadd.f32 %v587_v9, %v551_v44  ;;  %v351_v63 = vmul.f32 %v1709_v12, %v2248_v62  ;;  %v2354_v9 = vld [vmem:[%s2703_s2] ss:$0 sm:$0xff] }
  0xd5   : > { %v382_v2 = vadd.f32 %v350_v46, %v314_v45  ;;  %v418_v3 = vmul.f32 %v1711_v13, %v2305_v49  ;;  %v419_v4 = vmul.f32 %v1711_v13, %v2308_v0  ;;  %v484_v6 = vmul.f32 %v1713_v14, %v2189_v20  ;;  %v2366_v46 = vld [vmem:[%s1681_s6 + $0xc0] sm:$0xff] }
  0xd6   : > { %v1004_v7 = vsel %vm994_vm2, %v971_v56, %v987_v47  ;;  %v820_v8 = vadd.f32 %v1755_v36, %v618_v58  ;;  %v1020_v21 = vsel %vm994_vm2, %v987_v47, %v971_v56  ;;  %v383_v22 = vadd.f32 %v351_v63, %v315_v53 }
  0xd7   : > { %v1077_v23 = vadd.f32 %v1004_v7, %v948_v61  ;;  %v1046_v24 = vsel %vm258_vm3, %v1020_v21, 0.0  ;;  %v449_v25 = vadd.f32 %v418_v3, %v382_v2  ;;  %v520_v26 = vmul.f32 %v1718_v16, %v2245_v48  ;;  %v2369_v61 = vld [vmem:[%s1681_s6 + $0xc8] sm:$0xff] }
  0xd8   : > { %v949_v27 = vadd.f32 %v875_v41, %v820_v8  ;;  %v450_v28 = vadd.f32 %v419_v4, %v383_v22  ;;  %v588_v29 = vmul.f32 %v1720_v17, %v2305_v49  ;;  %v654_v36 = vmul.f32 %v1722_v18, %v2189_v20 }
  0xd9   : > { %1109 = vst [vmem:[%s1805_s24 + $0x90] sm:$0xff] %v1077_v23  ;;  %v552_v30 = vadd.f32 %v520_v26, %v484_v6  ;;  %v655_v31 = vmul.f32 %v1722_v18, %v2192_v51  ;;  %v690_v32 = vmul.f32 %v1724_v19, %v2245_v48  ;;  %v691_v33 = vmul.f32 %v1724_v19, %v2248_v62 }
  0xda   : > { %v1078_v34 = vadd.f32 %v1046_v24, %v949_v27  ;;  %v758_v37 = vmul.f32 %v1749_v35, %v2305_v49  ;;  %v759_v10 = vmul.f32 %v1749_v35, %v2308_v0  ;;  %v843_v52 = vrot.slane %v449_v25, 7 }
  0xdb   : > { %v619_v20 = vadd.f32 %v588_v29, %v552_v30  ;;  %v722_v57 = vadd.f32 %v690_v32, %v654_v36  ;;  %v723_v60 = vadd.f32 %v691_v33, %v655_v31  ;;  %v859_v55 = vrot.slane %v450_v28, 7 }
  0xdc   : > { %1110 = vst [vmem:[%s1805_s24 + $0x98] sm:$0xff] %v1078_v34  ;;  %v485_v38 = vmul.f32 %v1713_v14, %v2192_v51  ;;  %v521_v59 = vmul.f32 %v1718_v16, %v2248_v62  ;;  %v589_v39 = vmul.f32 %v1720_v17, %v2308_v0  ;;  %v316_v54 = vmul.f32 %v1707_v11, %v2245_v48 }
  0xdd   : > { %v789_v15 = vadd.f32 %v758_v37, %v722_v57  ;;  %v790_v40 = vadd.f32 %v759_v10, %v723_v60  ;;  %v821_v51 = vadd.f32 %v2354_v9, %v619_v20  ;;  %v892_v41 = vsel %vm865_vm0, %v859_v55, %v843_v52 }
  0xde   : > { %v918_v42 = vsel %vm255_vm1, %v892_v41, 0.0  ;;  %v553_v43 = vadd.f32 %v521_v59, %v485_v38  ;;  %v876_v50 = vsel %vm865_vm0, %v843_v52, %v859_v55  ;;  %v317_v44 = vmul.f32 %v1707_v11, %v2248_v62 }
  0xdf   : > { %v950_v56 = vadd.f32 %v918_v42, %v821_v51  ;;  %v972_v45 = vrot.slane %v789_v15, 1  ;;  %v988_v53 = vrot.slane %v790_v40, 1  ;;  %v352_v47 = vmul.f32 %v1709_v12, %v2305_v49 }
  0xe0   : > { %v620_v58 = vadd.f32 %v589_v39, %v553_v43  ;;  %v353_v63 = vmul.f32 %v1709_v12, %v2308_v0  ;;  %v420_v2 = vmul.f32 %v1711_v13, %v2366_v46  ;;  %v421_v3 = vmul.f32 %v1711_v13, %v2369_v61 }
  0xe1   : > { %v1005_v4 = vsel %vm994_vm2, %v972_v45, %v988_v53  ;;  %v1021_v6 = vsel %vm994_vm2, %v988_v53, %v972_v45  ;;  %v384_v7 = vadd.f32 %v352_v47, %v316_v54  ;;  %v486_v8 = vmul.f32 %v1713_v14, %v2245_v48  ;;  %v2426_v47 = vld [vmem:[%s1681_s6 + $0xd0] sm:$0xff] }
  0xe2   : > { %v1079_v21 = vadd.f32 %v1005_v4, %v950_v56  ;;  %v822_v22 = vadd.f32 %v2354_v9, %v620_v58  ;;  %v1048_v23 = vsel %vm258_vm3, %v1021_v6, 0.0  ;;  %v385_v24 = vadd.f32 %v353_v63, %v317_v44  ;;  %v2429_v58 = vld [vmem:[%s1681_s6 + $0xd8] sm:$0xff] }
  0xe3   : > { %v451_v25 = vadd.f32 %v420_v2, %v384_v7  ;;  %v522_v26 = vmul.f32 %v1718_v16, %v2305_v49  ;;  %v590_v27 = vmul.f32 %v1720_v17, %v2366_v46  ;;  %v656_v28 = vmul.f32 %v1722_v18, %v2245_v48 }
  0xe4   : > { %1111 = vst [vmem:[%s1805_s24 + $0xa0] sm:$0xff] %v1079_v21  ;;  %v951_v29 = vadd.f32 %v876_v50, %v822_v22  ;;  %v452_v36 = vadd.f32 %v421_v3, %v385_v24  ;;  %v657_v30 = vmul.f32 %v1722_v18, %v2248_v62  ;;  %v692_v31 = vmul.f32 %v1724_v19, %v2305_v49 }
  0xe5   : > { %v554_v32 = vadd.f32 %v522_v26, %v486_v8  ;;  %v693_v33 = vmul.f32 %v1724_v19, %v2308_v0  ;;  %v760_v34 = vmul.f32 %v1749_v35, %v2366_v46  ;;  %v761_v48 = vmul.f32 %v1749_v35, %v2369_v61 }
  0xe6   : > { %v1080_v37 = vadd.f32 %v1048_v23, %v951_v29  ;;  %v724_v10 = vadd.f32 %v692_v31, %v656_v28  ;;  %v844_v52 = vrot.slane %v451_v25, 7  ;;  %v860_v20 = vrot.slane %v452_v36, 7 }
  0xe7   : > { %v621_v57 = vadd.f32 %v590_v27, %v554_v32  ;;  %v725_v60 = vadd.f32 %v693_v33, %v657_v30  ;;  %v487_v55 = vmul.f32 %v1713_v14, %v2248_v62  ;;  %v523_v38 = vmul.f32 %v1718_v16, %v2308_v0 }
  0xe8   : > { %1112 = vst [vmem:[%s1805_s24 + $0xa8] sm:$0xff] %v1080_v37  ;;  %v791_v59 = vadd.f32 %v760_v34, %v724_v10  ;;  %v893_v39 = vsel %vm865_vm0, %v860_v20, %v844_v52  ;;  %v591_v54 = vmul.f32 %v1720_v17, %v2369_v61  ;;  %v877_v15 = vsel %vm865_vm0, %v844_v52, %v860_v20 }
  0xe9   : > { %v792_v40 = vadd.f32 %v761_v48, %v725_v60  ;;  %v823_v51 = vadd.f32 %v2354_v9, %v621_v57  ;;  %v920_v62 = vsel %vm255_vm1, %v893_v39, 0.0  ;;  %v555_v41 = vadd.f32 %v523_v38, %v487_v55 }
  0xea   : > { %v973_v42 = vrot.slane %v791_v59, 1  ;;  %v318_v43 = vmul.f32 %v1707_v11, %v2305_v49  ;;  %v319_v50 = vmul.f32 %v1707_v11, %v2308_v0  ;;  %v354_v44 = vmul.f32 %v1709_v12, %v2366_v46 }
  0xeb   : > { %v952_v56 = vadd.f32 %v920_v62, %v823_v51  ;;  %v989_v45 = vrot.slane %v792_v40, 1  ;;  %v622_v53 = vadd.f32 %v591_v54, %v555_v41  ;;  %v355_v63 = vmul.f32 %v1709_v12, %v2369_v61 }
  0xec   : > { %v386_v2 = vadd.f32 %v354_v44, %v318_v43  ;;  %v422_v3 = vmul.f32 %v1711_v13, %v2426_v47  ;;  %v423_v4 = vmul.f32 %v1711_v13, %v2429_v58  ;;  %v488_v6 = vmul.f32 %v1713_v14, %v2305_v49  ;;  %v2482_v44 = vld [vmem:[%s1681_s6 + $0xe0] sm:$0xff] }
  0xed   : > { %v1006_v7 = vsel %vm994_vm2, %v973_v42, %v989_v45  ;;  %v824_v8 = vadd.f32 %v2354_v9, %v622_v53  ;;  %v1022_v21 = vsel %vm994_vm2, %v989_v45, %v973_v42  ;;  %v387_v22 = vadd.f32 %v355_v63, %v319_v50 }
  0xee   : > { %v1081_v23 = vadd.f32 %v1006_v7, %v952_v56  ;;  %v1050_v24 = vsel %vm258_vm3, %v1022_v21, 0.0  ;;  %v453_v25 = vadd.f32 %v422_v3, %v386_v2  ;;  %v524_v26 = vmul.f32 %v1718_v16, %v2366_v46  ;;  %v2485_v56 = vld [vmem:[%s1681_s6 + $0xe8] sm:$0xff] }
  0xef   : > { %v953_v27 = vadd.f32 %v877_v15, %v824_v8  ;;  %v454_v28 = vadd.f32 %v423_v4, %v387_v22  ;;  %v592_v29 = vmul.f32 %v1720_v17, %v2426_v47  ;;  %v658_v36 = vmul.f32 %v1722_v18, %v2305_v49 }
  0xf0   : > { %1113 = vst [vmem:[%s1805_s24 + $0xb0] sm:$0xff] %v1081_v23  ;;  %v556_v30 = vadd.f32 %v524_v26, %v488_v6  ;;  %v659_v31 = vmul.f32 %v1722_v18, %v2308_v0  ;;  %v694_v32 = vmul.f32 %v1724_v19, %v2366_v46  ;;  %v695_v33 = vmul.f32 %v1724_v19, %v2369_v61 }
  0xf1   : > { %v1082_v34 = vadd.f32 %v1050_v24, %v953_v27  ;;  %v762_v48 = vmul.f32 %v1749_v35, %v2426_v47  ;;  %v763_v37 = vmul.f32 %v1749_v35, %v2429_v58  ;;  %v845_v10 = vrot.slane %v453_v25, 7 }
  0xf2   : > { %v623_v49 = vadd.f32 %v592_v29, %v556_v30  ;;  %v726_v52 = vadd.f32 %v694_v32, %v658_v36  ;;  %v727_v20 = vadd.f32 %v695_v33, %v659_v31  ;;  %v861_v57 = vrot.slane %v454_v28, 7 }
  0xf3   : > { %1114 = vst [vmem:[%s1805_s24 + $0xb8] sm:$0xff] %v1082_v34  ;;  %v489_v60 = vmul.f32 %v1713_v14, %v2308_v0  ;;  %v525_v55 = vmul.f32 %v1718_v16, %v2369_v61  ;;  %v593_v38 = vmul.f32 %v1720_v17, %v2429_v58  ;;  %v320_v59 = vmul.f32 %v1707_v11, %v2366_v46 }
  0xf4   : > { %v793_v39 = vadd.f32 %v762_v48, %v726_v52  ;;  %v794_v54 = vadd.f32 %v763_v37, %v727_v20  ;;  %v825_v15 = vadd.f32 %v2354_v9, %v623_v49  ;;  %v894_v40 = vsel %vm865_vm0, %v861_v57, %v845_v10 }
  0xf5   : > { %v922_v0 = vsel %vm255_vm1, %v894_v40, 0.0  ;;  %v557_v51 = vadd.f32 %v525_v55, %v489_v60  ;;  %v878_v62 = vsel %vm865_vm0, %v845_v10, %v861_v57  ;;  %v321_v41 = vmul.f32 %v1707_v11, %v2369_v61 }
  0xf6   : > { %v954_v42 = vadd.f32 %v922_v0, %v825_v15  ;;  %v974_v43 = vrot.slane %v793_v39, 1  ;;  %v990_v50 = vrot.slane %v794_v54, 1  ;;  %v356_v45 = vmul.f32 %v1709_v12, %v2426_v47 }
  0xf7   : > { %v624_v53 = vadd.f32 %v593_v38, %v557_v51  ;;  %v357_v63 = vmul.f32 %v1709_v12, %v2429_v58  ;;  %v424_v2 = vmul.f32 %v1711_v13, %v2482_v44  ;;  %v425_v3 = vmul.f32 %v1711_v13, %v2485_v56 }
  0xf8   : > { %v1007_v4 = vsel %vm994_vm2, %v974_v43, %v990_v50  ;;  %v1023_v6 = vsel %vm994_vm2, %v990_v50, %v974_v43  ;;  %v388_v7 = vadd.f32 %v356_v45, %v320_v59  ;;  %v490_v8 = vmul.f32 %v1713_v14, %v2366_v46  ;;  %v2542_v45 = vld [vmem:[%s1681_s6 + $0xf0] sm:$0xff] }
  0xf9   : > { %v1083_v21 = vadd.f32 %v1007_v4, %v954_v42  ;;  %v826_v22 = vadd.f32 %v2354_v9, %v624_v53  ;;  %v1052_v23 = vsel %vm258_vm3, %v1023_v6, 0.0  ;;  %v389_v24 = vadd.f32 %v357_v63, %v321_v41  ;;  %v2545_v53 = vld [vmem:[%s1681_s6 + $0xf8] sm:$0xff] }
  0xfa   : > { %v455_v25 = vadd.f32 %v424_v2, %v388_v7  ;;  %v526_v26 = vmul.f32 %v1718_v16, %v2426_v47  ;;  %v594_v27 = vmul.f32 %v1720_v17, %v2482_v44  ;;  %v660_v28 = vmul.f32 %v1722_v18, %v2366_v46 }
  0xfb   : > { %1115 = vst [vmem:[%s1805_s24 + $0xc0] sm:$0xff] %v1083_v21  ;;  %v955_v29 = vadd.f32 %v878_v62, %v826_v22  ;;  %v456_v36 = vadd.f32 %v425_v3, %v389_v24  ;;  %v661_v30 = vmul.f32 %v1722_v18, %v2369_v61  ;;  %v696_v31 = vmul.f32 %v1724_v19, %v2426_v47 }
  0xfc   : > { %v558_v32 = vadd.f32 %v526_v26, %v490_v8  ;;  %v697_v33 = vmul.f32 %v1724_v19, %v2429_v58  ;;  %v764_v34 = vmul.f32 %v1749_v35, %v2482_v44  ;;  %v765_v46 = vmul.f32 %v1749_v35, %v2485_v56 }
  0xfd   : > { %v1084_v48 = vadd.f32 %v1052_v23, %v955_v29  ;;  %v728_v37 = vadd.f32 %v696_v31, %v660_v28  ;;  %v846_v10 = vrot.slane %v455_v25, 7  ;;  %v862_v49 = vrot.slane %v456_v36, 7 }
  0xfe   : > { %v625_v52 = vadd.f32 %v594_v27, %v558_v32  ;;  %v729_v20 = vadd.f32 %v697_v33, %v661_v30  ;;  %v491_v57 = vmul.f32 %v1713_v14, %v2369_v61  ;;  %v527_v60 = vmul.f32 %v1718_v16, %v2429_v58 }
  0xff   : > { %1116 = vst [vmem:[%s1805_s24 + $0xc8] sm:$0xff] %v1084_v48  ;;  %v795_v55 = vadd.f32 %v764_v34, %v728_v37  ;;  %v895_v38 = vsel %vm865_vm0, %v862_v49, %v846_v10  ;;  %v595_v59 = vmul.f32 %v1720_v17, %v2485_v56  ;;  %v879_v39 = vsel %vm865_vm0, %v846_v10, %v862_v49 }
 0x100   : > { %v796_v54 = vadd.f32 %v765_v46, %v729_v20  ;;  %v827_v15 = vadd.f32 %v2354_v9, %v625_v52  ;;  %v924_v61 = vsel %vm255_vm1, %v895_v38, 0.0  ;;  %v559_v40 = vadd.f32 %v527_v60, %v491_v57 }
 0x101   : > { %v975_v0 = vrot.slane %v795_v55, 1  ;;  %v322_v51 = vmul.f32 %v1707_v11, %v2426_v47  ;;  %v323_v62 = vmul.f32 %v1707_v11, %v2429_v58  ;;  %v358_v41 = vmul.f32 %v1709_v12, %v2482_v44 }
 0x102   : > { %v956_v42 = vadd.f32 %v924_v61, %v827_v15  ;;  %v991_v43 = vrot.slane %v796_v54, 1  ;;  %v626_v50 = vadd.f32 %v595_v59, %v559_v40  ;;  %v359_v63 = vmul.f32 %v1709_v12, %v2485_v56 }
 0x103   : > { %v390_v2 = vadd.f32 %v358_v41, %v322_v51  ;;  %v426_v3 = vmul.f32 %v1711_v13, %v2542_v45  ;;  %v427_v4 = vmul.f32 %v1711_v13, %v2545_v53  ;;  %v492_v6 = vmul.f32 %v1713_v14, %v2426_v47 }
 0x104   : > { %v1008_v7 = vsel %vm994_vm2, %v975_v0, %v991_v43  ;;  %v828_v8 = vadd.f32 %v2354_v9, %v626_v50  ;;  %v1024_v21 = vsel %vm994_vm2, %v991_v43, %v975_v0  ;;  %v391_v22 = vadd.f32 %v359_v63, %v323_v62 }
 0x105   : > { %v1085_v23 = vadd.f32 %v1008_v7, %v956_v42  ;;  %v1054_v24 = vsel %vm258_vm3, %v1024_v21, 0.0  ;;  %v457_v25 = vadd.f32 %v426_v3, %v390_v2  ;;  %v528_v26 = vmul.f32 %v1718_v16, %v2482_v44 }
 0x106   : > { %v957_v27 = vadd.f32 %v879_v39, %v828_v8  ;;  %v458_v28 = vadd.f32 %v427_v4, %v391_v22  ;;  %v596_v29 = vmul.f32 %v1720_v17, %v2542_v45  ;;  %v662_v36 = vmul.f32 %v1722_v18, %v2426_v47 }
 0x107   : > { %1117 = vst [vmem:[%s1805_s24 + $0xd0] sm:$0xff] %v1085_v23  ;;  %v560_v30 = vadd.f32 %v528_v26, %v492_v6  ;;  %v663_v31 = vmul.f32 %v1722_v18, %v2429_v58  ;;  %v698_v32 = vmul.f32 %v1724_v19, %v2482_v44  ;;  %v699_v33 = vmul.f32 %v1724_v19, %v2485_v56 }
 0x108   : > { %v1086_v34 = vadd.f32 %v1054_v24, %v957_v27  ;;  %v766_v46 = vmul.f32 %v1749_v35, %v2542_v45  ;;  %v767_v48 = vmul.f32 %v1749_v35, %v2545_v53  ;;  %v847_v37 = vrot.slane %v457_v25, 7 }
 0x109   : > { %v627_v47 = vadd.f32 %v596_v29, %v560_v30  ;;  %v730_v10 = vadd.f32 %v698_v32, %v662_v36  ;;  %v731_v49 = vadd.f32 %v699_v33, %v663_v31  ;;  %v863_v52 = vrot.slane %v458_v28, 7 }
 0x10a   : > { %1118 = vst [vmem:[%s1805_s24 + $0xd8] sm:$0xff] %v1086_v34  ;;  %v493_v20 = vmul.f32 %v1713_v14, %v2429_v58  ;;  %v529_v57 = vmul.f32 %v1718_v16, %v2485_v56  ;;  %v597_v60 = vmul.f32 %v1720_v17, %v2545_v53  ;;  %v324_v55 = vmul.f32 %v1707_v11, %v2482_v44 }
 0x10b   : > { %v797_v38 = vadd.f32 %v766_v46, %v730_v10  ;;  %v798_v59 = vadd.f32 %v767_v48, %v731_v49  ;;  %v829_v39 = vadd.f32 %v2354_v9, %v627_v47  ;;  %v896_v54 = vsel %vm865_vm0, %v863_v52, %v847_v37 }
 0x10c   : > { %v926_v15 = vsel %vm255_vm1, %v896_v54, 0.0  ;;  %v561_v58 = vadd.f32 %v529_v57, %v493_v20  ;;  %v880_v61 = vsel %vm865_vm0, %v847_v37, %v863_v52  ;;  %v325_v40 = vmul.f32 %v1707_v11, %v2485_v56 }
 0x10d   : > { %v958_v0 = vadd.f32 %v926_v15, %v829_v39  ;;  %v976_v51 = vrot.slane %v797_v38, 1  ;;  %v992_v62 = vrot.slane %v798_v59, 1  ;;  %v360_v41 = vmul.f32 %v1709_v12, %v2542_v45 }
 0x10e   : > { %v628_v42 = vadd.f32 %v597_v60, %v561_v58  ;;  %v361_v43 = vmul.f32 %v1709_v12, %v2545_v53  ;;  %v428_v50 = vmul.f32 0.0, %v1711_v13  ;;  %v494_v63 = vmul.f32 %v1713_v14, %v2482_v44 }
 0x10f   : > { %v1009_v2 = vsel %vm994_vm2, %v976_v51, %v992_v62  ;;  %v1025_v11 = vsel %vm994_vm2, %v992_v62, %v976_v51  ;;  %v392_v3 = vadd.f32 %v360_v41, %v324_v55  ;;  %v530_v4 = vmul.f32 %v1718_v16, %v2542_v45 }
 0x110   : > { %v1087_v6 = vadd.f32 %v1009_v2, %v958_v0  ;;  %v830_v7 = vadd.f32 %v2354_v9, %v628_v42  ;;  %v1056_v12 = vsel %vm258_vm3, %v1025_v11, 0.0  ;;  %v393_v13 = vadd.f32 %v361_v43, %v325_v40 }
 0x111   : > { %v459_v8 = vadd.f32 %v428_v50, %v392_v3  ;;  %v562_v21 = vadd.f32 %v530_v4, %v494_v63  ;;  %v598_v22 = vmul.f32 0.0, %v1720_v17  ;;  %v664_v23 = vmul.f32 %v1722_v18, %v2482_v44 }
 0x112   : > { %1119 = vst [vmem:[%s1805_s24 + $0xe0] sm:$0xff] %v1087_v6  ;;  %v959_v24 = vadd.f32 %v880_v61, %v830_v7  ;;  %v460_v25 = vadd.f32 %v428_v50, %v393_v13  ;;  %v665_v26 = vmul.f32 %v1722_v18, %v2485_v56  ;;  %v700_v27 = vmul.f32 %v1724_v19, %v2542_v45 }
 0x113   : > { %v629_v28 = vadd.f32 %v598_v22, %v562_v21  ;;  %v701_v29 = vmul.f32 %v1724_v19, %v2545_v53  ;;  %v768_v36 = vmul.f32 0.0, %v1749_v35  ;;  %v848_v17 = vrot.slane %v459_v8, 7 }
 0x114   : > { %v1088_v30 = vadd.f32 %v1056_v12, %v959_v24  ;;  %v732_v31 = vadd.f32 %v700_v27, %v664_v23  ;;  %v864_v44 = vrot.slane %v460_v25, 7  ;;  %v495_v32 = vmul.f32 %v1713_v14, %v2485_v56 }
 0x115   : > { %v733_v33 = vadd.f32 %v701_v29, %v665_v26  ;;  %v831_v34 = vadd.f32 %v2354_v9, %v629_v28  ;;  %v531_v18 = vmul.f32 %v1718_v16, %v2545_v53 }
 0x116   : > { %1120 = vst [vmem:[%s1805_s24 + $0xe8] sm:$0xff] %v1088_v30  ;;  %v799_v45 = vadd.f32 %v768_v36, %v732_v31  ;;  %v897_v19 = vsel %vm865_vm0, %v864_v44, %v848_v17  ;;  %v881_v16 = vsel %vm865_vm0, %v848_v17, %v864_v44 }
 0x117   : > { %v800_v35 = vadd.f32 %v768_v36, %v733_v33  ;;  %v928_v46 = vsel %vm255_vm1, %v897_v19, 0.0  ;;  %v563_v48 = vadd.f32 %v531_v18, %v495_v32 }
 0x118   : > { %v960_v14 = vadd.f32 %v928_v46, %v831_v34  ;;  %v977_v56 = vrot.slane %v799_v45, 1 }
 0x119   : > { %v993_v37 = vrot.slane %v800_v35, 1  ;;  %v630_v47 = vadd.f32 %v598_v22, %v563_v48 }
 0x11b   : > { %v1010_v53 = vsel %vm994_vm2, %v977_v56, %v993_v37  ;;  %v832_v10 = vadd.f32 %v2354_v9, %v630_v47  ;;  %v1026_v49 = vsel %vm994_vm2, %v993_v37, %v977_v56 }
 0x11c   : > { %v1089_v52 = vadd.f32 %v1010_v53, %v960_v14  ;;  %v1058_v20 = vsel %vm258_vm3, %v1026_v49, 0.0 }
 0x11d   : > { %v961_v57 = vadd.f32 %v881_v16, %v832_v10 }
 0x11e   : > { %1121 = vst [vmem:[%s1805_s24 + $0xf0] sm:$0xff] %v1089_v52 }
 0x11f   : > { %v1090_v1 = vadd.f32 %v1058_v20, %v961_v57 }
 0x121   : > { %1122 = vst [vmem:[%s1805_s24 + $0xf8] sm:$0xff] %v1090_v1 }
 0x122   : > { %1419 = shalt.err (!%p1416_p5)
}
 0x123   : > { %s1420_s4 = scalar_lea.hbm %s2649_s8, 4096  ;;  %s1424_s22 = scalar_lea.hbm %s2704_s3, 8192 }
 0x124   : > { %p1421_p9 = scmp.ne.s32.totalorder %s2649_s8, %s1420_s4  ;;  %p1425_p3 = scmp.lt.u32.totalorder %s2649_s8, %s2704_s3 }
 0x125   : > { %p1426_p7 = scmp.lt.u32.totalorder %s1424_s22, %s1420_s4  ;;  %p1428_p4 = scmp.lt.u32.totalorder %s1420_s4, %s2649_s8 }
 0x126   : > { %p1422_p1 = pnand %p1421_p9, %p1619_p10 }
 0x127   : > { %p1427_p13 = por %p1426_p7, %p1425_p3 }
 0x128   : > { %p1423_p2 = pneg %p1422_p1 }
 0x129   : > { %p1429_p6 = por %p1428_p4, %p1427_p13 }
 0x12b   : > { %p1430_p8 = pnand %p1429_p6, %p1423_p2 }
 0x12d   : > { %1433 = shalt.err (!%p1430_p8)
}
 0x12e   : > { %s1501_s10 = smov 128   ;;  %s1502_s11 = smov 8  }
 0x12f   : > { %1274 = dma.vmem_to_hbm [thread:$0]  (%p1619_p10), %s2651_s18, 4096, %s2649_s8, %s1124_s15, %s1501_s10, %s1501_s10, %s1502_s11  }
 0x130 PF: > { %s1153_s26 = sand.u32 1, %s1472_s12   ;;  %p2722_p12 = scmp.ne.s32.totalorder %s2712_s23, 0 }
 0x131   : > { %p2723_p11 = scmp.ge.s32.totalorder %s1492_s17, 2  ;;  %s1154_s7 = scalar_lea.sflag [#allocation4], %s1153_s26 }
 0x133   : > { %p1285_p0 = pnand %p2723_p11, %p2722_p12 }
 0x135   : > { %1467 = dma.done.wait (!%p1285_p0), %s1154_s7, 4096  }
 0x136   : > { %1469 = vsyncadd (!%p1285_p0), %s1154_s7, 4294963200  ;;  %s20_s17 = sadd.s32 1, %s1492_s17   ;;  %s2724_s12 = smov %s1476_s13 }
 0x137   : > { %p17_p5 = scmp.ge.s32.totalorder %s20_s17, 4   ;;  %s2725_s13 = smov %s1480_s14 }
 0x138   : > { %s2726_s14 = smov %s1628_s5  ;;  %s2727_s15 = smov %s1488_s16 }
 0x139   : > { %s2728_s16 = smov %s2730_s28  ;;  %19 = sbr.rel (!%p17_p5) target bundleno = 7 (0x7), region = 85 }
 0x140   :  { %1159 = vsyncpa [#allocation3], 1 }
 0x141   :  { %1161 = vsyncpa [#allocation3 + $0x1], 1 }
 0x142   :  { %1162 = vsyncpa [#allocation6], 1 }
 0x143   :  { %1163 = vsyncpa [#allocation4], 1 }
 0x144   :  { %1165 = vsyncpa [#allocation4 + $0x1], 1 }

</bundles_post_ra>
